<compile_context>
chip_gen: v7x
topology: tpu7x:2x2x1
jax: 0.10.0
libtpu: 0.0.40
codegen_flags: <defaults>
</compile_context>

<pallas_src>
import jax
import jax.numpy as jnp
from jax.experimental import pallas as pl
from jax.experimental.pallas import tpu as pltpu

F_IN = 1024   # input feature dim
L = 512       # feature dim after the feature layer
D = 128       # gated-attention hidden dim


def _next_pow2_bucket(n):
    b = 16
    while b < n:
        b *= 2
    return b


def attention_gated_kernel(n_ref, x_ref, wf_ref, bf_ref, wab_ref, wc_ref,
                           m_out, l_out, acc_out, m_sc, l_sc, acc_sc):
    c = pl.program_id(0)                     # core (parallel) index
    i = pl.program_id(1)                     # instance-tile (reduction) index
    tiles_per_core = pl.num_programs(1)
    tile = x_ref.shape[0]
    n_valid = n_ref[0]                       # runtime bag size (SMEM scalar prefetch)

    @pl.when(i == 0)
    def _init():
        m_sc[...] = jnp.full_like(m_sc, -jnp.inf)
        l_sc[...] = jnp.zeros_like(l_sc)
        acc_sc[...] = jnp.zeros_like(acc_sc)

    # In-kernel cast: x is DMA'd as f32, the MXU is fed bf16 (VPU has slack under the
    # MXU-bound step; saves a full-array XLA cast pass in HBM).
    x = x_ref[...].astype(jnp.bfloat16)                               # (T, 1024)

    # feature: Linear(1024, 512) + ReLU  (Dropout(0.25) == identity in eval)
    h = jnp.dot(x, wf_ref[...], preferred_element_type=jnp.float32) + bf_ref[...]
    h = jnp.maximum(h, 0.0)                                           # (T, 512) f32

    # gated attention branches fused into one 256-wide matmul, then split.
    ab = jnp.dot(h.astype(jnp.bfloat16), wab_ref[...],
                 preferred_element_type=jnp.float32)                  # (T, 256) f32
    a = jnp.maximum(ab[:, :D], 0.0)                                   # ReLU branch
    b = jax.nn.sigmoid(ab[:, D:])                                     # Sigmoid branch
    gated = a * b                                                     # (T, 128) f32

    # attention_c as a VPU/XLU lane reduction (avoids a 1-column MXU matmul).
    s = jnp.sum(gated * wc_ref[...], axis=-1, keepdims=True)          # (T, 1)

    # Mask rows beyond the real bag size (ragged last tile / padded bucket).
    row = (c * tiles_per_core + i) * tile + \
        jax.lax.broadcasted_iota(jnp.int32, s.shape, 0)
    s = jnp.where(row < n_valid, s, -jnp.inf)

    # Online softmax over instances + weighted pooling of the features h.
    m_prev = m_sc[...]                                                # (1, 1)
    m_new = jnp.maximum(m_prev, jnp.max(s, axis=0, keepdims=True))    # (1, 1)
    # Guards keep fully-masked tiles NaN-free: alpha/p forced to 0 instead of exp(nan).
    alpha = jnp.where(m_new == -jnp.inf, 0.0, jnp.exp(m_prev - m_new))
    p = jnp.where(s == -jnp.inf, 0.0, jnp.exp(s - m_new))             # (T, 1)
    l_sc[...] = alpha * l_sc[...] + jnp.sum(p, axis=0, keepdims=True)
    # TODO(synk): on v5e move this p*h reduce onto the MXU (dot_general contracting dim 0)
    # if the bundle shows vst/VALU pressure; it is neutral filler on v6e/v7x.
    acc_sc[...] = alpha * acc_sc[...] + jnp.sum(p * h, axis=0, keepdims=True)
    m_sc[...] = m_new

    @pl.when(i == tiles_per_core - 1)
    def _finalize():
        m_out[...] = m_sc[...]
        l_out[...] = l_sc[...]
        acc_out[...] = acc_sc[...]


def attention_gated(x, prep, *, tile=1024, num_cores=2):
    """x: (1, N, 1024) like the torch module (it squeezes dim 0). Returns (1, 2) f32.

    `prep` is the output of prepare_params (weights fused / cast once).
    `tile` must be a power of two >= 16.  Default 1024 fits the 32 MiB default scoped
    VMEM on all generations; 2048 needs an explicit vmem_limit_bytes (watch v7x 64 MiB).
    """
    assert tile >= 16 and (tile & (tile - 1)) == 0, "tile must be a power of two >= 16"
    x2d = jnp.squeeze(x, axis=0)                                      # (N, 1024)
    N = x2d.shape[0]

    # Bucket the row count (power of two, >= 16) so distinct bag sizes share compiled
    # kernels; the true N is passed at runtime via scalar prefetch.
    n_pad = _next_pow2_bucket(N)
    T = min(tile, n_pad)                                              # multiple of 16
    num_tiles = n_pad // T
    C = num_cores if (num_tiles >= num_cores and num_tiles % num_cores == 0) else 1
    tiles_per_core = num_tiles // C
    if n_pad != N:
        # TODO(synk): in serving, keep bags pre-padded to bucket sizes to skip this pass.
        x2d = jnp.pad(x2d, ((0, n_pad - N), (0, 0)))
    n_valid = jnp.full((1,), N, jnp.int32)

    wf, bf, wab, wc_row = prep["wf"], prep["bf"], prep["wab"], prep["wc"]

    def resident(arr):
        # Constant block index -> stays VMEM-resident across grid steps (no re-DMA).
        return pl.BlockSpec(arr.shape, lambda c, i, n: (0, 0))

    m_p, l_p, acc_p = pl.pallas_call(
        attention_gated_kernel,
        out_shape=(
            jax.ShapeDtypeStruct((C, 1, 1), jnp.float32),   # per-core running max m
            jax.ShapeDtypeStruct((C, 1, 1), jnp.float32),   # per-core softmax denom l
            jax.ShapeDtypeStruct((C, 1, L), jnp.float32),   # per-core sum_n p_n * h_n
        ),
        grid_spec=pltpu.PrefetchScalarGridSpec(
            num_scalar_prefetch=1,
            grid=(C, tiles_per_core),
            in_specs=[
                pl.BlockSpec((T, F_IN),
                             lambda c, i, n: (c * tiles_per_core + i, 0)),  # x tile
                resident(wf), resident(bf), resident(wab), resident(wc_row),
            ],
            out_specs=[
                pl.BlockSpec((None, 1, 1), lambda c, i, n: (c, 0, 0)),
                pl.BlockSpec((None, 1, 1), lambda c, i, n: (c, 0, 0)),
                pl.BlockSpec((None, 1, L), lambda c, i, n: (c, 0, 0)),
            ],
            scratch_shapes=[
                pltpu.VMEM((1, 1), jnp.float32),            # running max   m
                pltpu.VMEM((1, 1), jnp.float32),            # running denom l
                pltpu.VMEM((1, L), jnp.float32),            # running sum_n p_n * h_n
            ],
        ),
        compiler_params=pltpu.CompilerParams(
            # Inner axis is the instance reduction; outer axis splits it across the two
            # v7x TensorCores (harmless / sequential on single-TC v5e/v6e).
            dimension_semantics=("parallel", "arbitrary"),
        ),
    )(n_valid, x2d, wf, bf, wab, wc_row)

    # Tiny cross-core combine + classifier in plain JAX ((C, 512)-sized work).
    m = m_p[:, 0, 0]                                        # (C,)
    l = l_p[:, 0, 0]                                        # (C,)
    acc = acc_p[:, 0, :]                                    # (C, L)
    m_g = jnp.max(m)
    alpha = jnp.where(m == -jnp.inf, 0.0, jnp.exp(m - m_g))
    l_g = jnp.sum(alpha * l)
    pooled = jnp.sum(alpha[:, None] * acc, axis=0, keepdims=True) / l_g   # (1, L) == A @ h
    return pooled @ prep["wcls"] + prep["bcls"]                            # (1, 2)


# ----------------------------- parameters & reference -----------------------------

def xavier_normal(key, fan_in, fan_out):
    std = (2.0 / (fan_in + fan_out)) ** 0.5
    # Stored as (in, out); std is symmetric in fan_in/fan_out so it matches torch.
    return std * jax.random.normal(key, (fan_in, fan_out), dtype=jnp.float32)


def init_params(key):
    k = jax.random.split(key, 5)
    return {
        "wf":   xavier_normal(k[0], F_IN, L),             # feature Linear(1024, 512)
        "bf":   jnp.zeros((1, L), jnp.float32),           # bias zero-init
        "wa":   xavier_normal(k[1], L, D),                # attention_a (no bias)
        "wb":   xavier_normal(k[2], L, D),                # attention_b (no bias)
        "wc":   xavier_normal(k[3], D, 1),                # attention_c (no bias)
        "wcls": xavier_normal(k[4], L, 2),                # classifier Linear(512, 2)
        "bcls": jnp.zeros((1, 2), jnp.float32),
    }


def prepare_params(params):
    """One-time kernel-ready parameter prep (concat + bf16 casts done once, not per call)."""
    return {
        "wf":   params["wf"].astype(jnp.bfloat16),                                  # (1024, 512)
        "bf":   params["bf"].astype(jnp.float32).reshape(1, L),                     # (1, 512)
        "wab":  jnp.concatenate([params["wa"], params["wb"]], axis=1).astype(jnp.bfloat16),  # (512, 256)
        "wc":   params["wc"].reshape(1, D).astype(jnp.float32),                     # (1, 128)
        "wcls": params["wcls"].astype(jnp.float32),                                 # (512, 2)
        "bcls": params["bcls"].astype(jnp.float32).reshape(1, 2),                   # (1, 2)
    }


def attention_gated_ref(x, params):
    """Pure-JAX f32 reference of the torch forward pass."""
    h = jnp.maximum(jnp.squeeze(x, axis=0) @ params["wf"] + params["bf"], 0.0)
    a = jnp.maximum(h @ params["wa"], 0.0)
    b = jax.nn.sigmoid(h @ params["wb"])
    s = (a * b) @ params["wc"]                            # (N, 1)
    w = jax.nn.softmax(s[:, 0])                           # (N,)
    pooled = w @ h                                        # (512,)
    return pooled @ params["wcls"] + params["bcls"]       # (1, 2)


if __name__ == "__main__":
    key = jax.random.PRNGKey(0)
    pkey, k1, k2 = jax.random.split(key, 3)
    params = init_params(pkey)
    prep = prepare_params(params)

    # Small single-tile bag.
    N1 = 8
    x1 = jax.random.normal(k1, (1, N1, F_IN), dtype=jnp.float32)
    y1 = attention_gated(x1, prep)
    jax.block_until_ready(y1)
    y1_ref = attention_gated_ref(x1, params)
    assert y1.shape == (1, 2)
    assert bool(jnp.all(jnp.isfinite(y1)))
    assert jnp.allclose(y1, y1_ref, rtol=5e-2, atol=5e-2), (y1, y1_ref)

    # Multi-tile bag exercising the 2-core split, ragged masking and a fully-masked tile
    # (N=300 with tile=128 -> bucket 512, 4 tiles, 2 per core; rows 300..511 masked).
    N2 = 300
    x2 = jax.random.normal(k2, (1, N2, F_IN), dtype=jnp.float32)
    y2 = attention_gated(x2, prep, tile=128)
    jax.block_until_ready(y2)
    y2_ref = attention_gated_ref(x2, params)
    assert y2.shape == (1, 2)
    assert bool(jnp.all(jnp.isfinite(y2)))
    assert jnp.allclose(y2, y2_ref, rtol=5e-2, atol=5e-2), (y2, y2_ref)

    print("KERNEL_OK")
</pallas_src>

<mosaic_0001>
module attributes {stable_mosaic.version = 11 : i64} {
  func.func @attention_gated_kernel(%arg0: i32, %arg1: i32, %arg2: memref<1xi32, #tpu.memory_space<smem>>, %arg3: memref<16x1024xf32, #tpu.memory_space<vmem>>, %arg4: memref<1024x512xbf16, #tpu.memory_space<vmem>>, %arg5: memref<1x512xf32, #tpu.memory_space<vmem>>, %arg6: memref<512x256xbf16, #tpu.memory_space<vmem>>, %arg7: memref<1x128xf32, #tpu.memory_space<vmem>>, %arg8: memref<1x1x1xf32, #tpu.memory_space<vmem>>, %arg9: memref<1x1x1xf32, #tpu.memory_space<vmem>>, %arg10: memref<1x1x512xf32, #tpu.memory_space<vmem>>, %arg11: memref<1x1xf32, #tpu.memory_space<vmem>>, %arg12: memref<1x1xf32, #tpu.memory_space<vmem>>, %arg13: memref<1x512xf32, #tpu.memory_space<vmem>>) attributes {dimension_semantics = [#tpu.dimension_semantics<parallel>, #tpu.dimension_semantics<arbitrary>], iteration_bounds = array<i64: 1, 1>, scalar_prefetch = 1 : i64, scratch_operands = 3 : i64, tpu.core_type = #tpu.core_type<tc>, window_params = [{transform_indices = @transform_0, window_bounds = array<i64: 16, 1024>}, {pipeline_mode = #tpu.pipeline_mode<synchronous>, transform_indices = @transform_1, window_bounds = array<i64: 1024, 512>}, {pipeline_mode = #tpu.pipeline_mode<synchronous>, transform_indices = @transform_2, window_bounds = array<i64: 1, 512>}, {pipeline_mode = #tpu.pipeline_mode<synchronous>, transform_indices = @transform_3, window_bounds = array<i64: 512, 256>}, {pipeline_mode = #tpu.pipeline_mode<synchronous>, transform_indices = @transform_4, window_bounds = array<i64: 1, 128>}, {transform_indices = @transform_5, window_bounds = array<i64: 1, 1, 1>}, {transform_indices = @transform_6, window_bounds = array<i64: 1, 1, 1>}, {transform_indices = @transform_7, window_bounds = array<i64: 1, 1, 512>}]} {
    %c0 = arith.constant 0 : index
    %0 = memref.load %arg2[%c0] : memref<1xi32, #tpu.memory_space<smem>>
    %c0_i32 = arith.constant 0 : i32
    %1 = arith.cmpi eq, %arg1, %c0_i32 : i32
    %2 = arith.extui %1 : i1 to i32
    %c0_i32_0 = arith.constant 0 : i32
    %3 = arith.cmpi ne, %2, %c0_i32_0 : i32
    scf.if %3 {
      %cst_38 = arith.constant 0xFF800000 : f32
      %77 = vector.broadcast %cst_38 : f32 to vector<1x1xf32>
      %c0_39 = arith.constant 0 : index
      %c0_40 = arith.constant 0 : index
      %78 = vector.load %arg11[%c0_39, %c0_40] : memref<1x1xf32, #tpu.memory_space<vmem>>, vector<1x1xf32>
      tpu.vector_store %arg11[%c0_39, %c0_40], %77 {strides = array<i32>} : memref<1x1xf32, #tpu.memory_space<vmem>>, vector<1x1xf32>,
      %cst_41 = arith.constant 0.000000e+00 : f32
      %79 = vector.broadcast %cst_41 : f32 to vector<1x1xf32>
      %c0_42 = arith.constant 0 : index
      %c0_43 = arith.constant 0 : index
      %80 = vector.load %arg12[%c0_42, %c0_43] : memref<1x1xf32, #tpu.memory_space<vmem>>, vector<1x1xf32>
      tpu.vector_store %arg12[%c0_42, %c0_43], %79 {strides = array<i32>} : memref<1x1xf32, #tpu.memory_space<vmem>>, vector<1x1xf32>,
      %cst_44 = arith.constant 0.000000e+00 : f32
      %81 = vector.broadcast %cst_44 : f32 to vector<1x512xf32>
      %c0_45 = arith.constant 0 : index
      %c0_46 = arith.constant 0 : index
      %82 = vector.load %arg13[%c0_45, %c0_46] : memref<1x512xf32, #tpu.memory_space<vmem>>, vector<1x512xf32>
      tpu.vector_store %arg13[%c0_45, %c0_46], %81 {strides = array<i32>} : memref<1x512xf32, #tpu.memory_space<vmem>>, vector<1x512xf32>,
    } else {
    }
    %c0_1 = arith.constant 0 : index
    %c0_2 = arith.constant 0 : index
    %4 = vector.load %arg3[%c0_1, %c0_2] : memref<16x1024xf32, #tpu.memory_space<vmem>>, vector<16x1024xf32>
    %5 = arith.truncf %4 : vector<16x1024xf32> to vector<16x1024xbf16>
    %c0_3 = arith.constant 0 : index
    %c0_4 = arith.constant 0 : index
    %6 = vector.load %arg4[%c0_3, %c0_4] : memref<1024x512xbf16, #tpu.memory_space<vmem>>, vector<1024x512xbf16>
    %cst = arith.constant dense<0.000000e+00> : vector<16x512xf32>
    %7 = tpu.matmul %5, %6, %cst {dimension_numbers = #tpu.dot_dimension_numbers<[1], [0], [0], [1], [0, 0, 1, 1], [], []>} : vector<16x1024xbf16>, vector<1024x512xbf16>, vector<16x512xf32> -> vector<16x512xf32>
    %c0_5 = arith.constant 0 : index
    %c0_6 = arith.constant 0 : index
    %8 = vector.load %arg5[%c0_5, %c0_6] : memref<1x512xf32, #tpu.memory_space<vmem>>, vector<1x512xf32>
    %9 = vector.broadcast %8 : vector<1x512xf32> to vector<16x512xf32>
    %10 = arith.addf %7, %9 : vector<16x512xf32>
    %cst_7 = arith.constant 0.000000e+00 : f32
    %11 = vector.broadcast %cst_7 : f32 to vector<16x512xf32>
    %12 = arith.maximumf %10, %11 : vector<16x512xf32>
    %13 = arith.truncf %12 : vector<16x512xf32> to vector<16x512xbf16>
    %c0_8 = arith.constant 0 : index
    %c0_9 = arith.constant 0 : index
    %14 = vector.load %arg6[%c0_8, %c0_9] : memref<512x256xbf16, #tpu.memory_space<vmem>>, vector<512x256xbf16>
    %cst_10 = arith.constant dense<0.000000e+00> : vector<16x256xf32>
    %15 = tpu.matmul %13, %14, %cst_10 {dimension_numbers = #tpu.dot_dimension_numbers<[1], [0], [0], [1], [0, 0, 1, 1], [], []>} : vector<16x512xbf16>, vector<512x256xbf16>, vector<16x256xf32> -> vector<16x256xf32>
    %16 = vector.extract_strided_slice %15 {offsets = [0, 0], sizes = [16, 128], strides = [1, 1]} : vector<16x256xf32> to vector<16x128xf32>
    %cst_11 = arith.constant 0.000000e+00 : f32
    %17 = vector.broadcast %cst_11 : f32 to vector<16x128xf32>
    %18 = arith.maximumf %16, %17 : vector<16x128xf32>
    %19 = vector.extract_strided_slice %15 {offsets = [0, 128], sizes = [16, 128], strides = [1, 1]} : vector<16x256xf32> to vector<16x128xf32>
    %20 = arith.negf %19 : vector<16x128xf32>
    %21 = math.exp %20 : vector<16x128xf32>
    %cst_12 = arith.constant 1.000000e+00 : f32
    %22 = vector.broadcast %cst_12 : f32 to vector<16x128xf32>
    %23 = arith.addf %22, %21 : vector<16x128xf32>
    %24 = arith.divf %22, %23 : vector<16x128xf32>
    %25 = arith.mulf %18, %24 : vector<16x128xf32>
    %c0_13 = arith.constant 0 : index
    %c0_14 = arith.constant 0 : index
    %26 = vector.load %arg7[%c0_13, %c0_14] : memref<1x128xf32, #tpu.memory_space<vmem>>, vector<1x128xf32>
    %27 = vector.broadcast %26 : vector<1x128xf32> to vector<16x128xf32>
    %28 = arith.mulf %25, %27 : vector<16x128xf32>
    %cst_15 = arith.constant dense<0.000000e+00> : vector<16xf32>
    %29 = vector.multi_reduction <add>, %28, %cst_15 [1] : vector<16x128xf32> to vector<16xf32>
    %30 = vector.shape_cast %29 : vector<16xf32> to vector<16x1xf32>
    %c1_i32 = arith.constant 1 : i32
    %31 = arith.muli %arg0, %c1_i32 : i32
    %32 = arith.addi %31, %arg1 : i32
    %c16_i32 = arith.constant 16 : i32
    %33 = arith.muli %32, %c16_i32 : i32
    %34 = tpu.iota {dimensions = array<i32: 0>} : vector<16x1xi32>
    %35 = vector.broadcast %33 : i32 to vector<16x1xi32>
    %36 = arith.addi %35, %34 : vector<16x1xi32>
    %37 = vector.broadcast %0 : i32 to vector<16x1xi32>
    %38 = arith.cmpi slt, %36, %37 : vector<16x1xi32>
    %cst_16 = arith.constant 0xFF800000 : f32
    %39 = vector.broadcast %cst_16 : f32 to vector<16x1xf32>
    %40 = arith.select %38, %30, %39 : vector<16x1xi1>, vector<16x1xf32>
    %c0_17 = arith.constant 0 : index
    %c0_18 = arith.constant 0 : index
    %41 = vector.load %arg11[%c0_17, %c0_18] : memref<1x1xf32, #tpu.memory_space<vmem>>, vector<1x1xf32>
    %cst_19 = arith.constant dense<0xFF800000> : vector<1xf32>
    %42 = vector.multi_reduction <maximumf>, %40, %cst_19 [0] : vector<16x1xf32> to vector<1xf32>
    %43 = vector.shape_cast %42 : vector<1xf32> to vector<1x1xf32>
    %44 = arith.maximumf %41, %43 : vector<1x1xf32>
    %cst_20 = arith.constant 0xFF800000 : f32
    %45 = vector.broadcast %cst_20 : f32 to vector<1x1xf32>
    %46 = arith.cmpf oeq, %44, %45 : vector<1x1xf32>
    %47 = arith.subf %41, %44 : vector<1x1xf32>
    %48 = math.exp %47 : vector<1x1xf32>
    %cst_21 = arith.constant 0.000000e+00 : f32
    %49 = vector.broadcast %cst_21 : f32 to vector<1x1xf32>
    %50 = arith.select %46, %49, %48 : vector<1x1xi1>, vector<1x1xf32>
    %cst_22 = arith.constant 0xFF800000 : f32
    %51 = vector.broadcast %cst_22 : f32 to vector<16x1xf32>
    %52 = arith.cmpf oeq, %40, %51 : vector<16x1xf32>
    %53 = vector.broadcast %44 : vector<1x1xf32> to vector<16x1xf32>
    %54 = arith.subf %40, %53 : vector<16x1xf32>
    %55 = math.exp %54 : vector<16x1xf32>
    %cst_23 = arith.constant 0.000000e+00 : f32
    %56 = vector.broadcast %cst_23 : f32 to vector<16x1xf32>
    %57 = arith.select %52, %56, %55 : vector<16x1xi1>, vector<16x1xf32>
    %c0_24 = arith.constant 0 : index
    %c0_25 = arith.constant 0 : index
    %58 = vector.load %arg12[%c0_24, %c0_25] : memref<1x1xf32, #tpu.memory_space<vmem>>, vector<1x1xf32>
    %59 = arith.mulf %50, %58 : vector<1x1xf32>
    %cst_26 = arith.constant dense<0.000000e+00> : vector<1xf32>
    %60 = vector.multi_reduction <add>, %57, %cst_26 [0] : vector<16x1xf32> to vector<1xf32>
    %61 = vector.shape_cast %60 : vector<1xf32> to vector<1x1xf32>
    %62 = arith.addf %59, %61 : vector<1x1xf32>
    %c0_27 = arith.constant 0 : index
    %c0_28 = arith.constant 0 : index
    %63 = vector.load %arg12[%c0_27, %c0_28] : memref<1x1xf32, #tpu.memory_space<vmem>>, vector<1x1xf32>
    tpu.vector_store %arg12[%c0_27, %c0_28], %62 {strides = array<i32>} : memref<1x1xf32, #tpu.memory_space<vmem>>, vector<1x1xf32>,
    %c0_29 = arith.constant 0 : index
    %c0_30 = arith.constant 0 : index
    %64 = vector.load %arg13[%c0_29, %c0_30] : memref<1x512xf32, #tpu.memory_space<vmem>>, vector<1x512xf32>
    %65 = vector.broadcast %50 : vector<1x1xf32> to vector<1x512xf32>
    %66 = arith.mulf %65, %64 : vector<1x512xf32>
    %67 = vector.broadcast %57 : vector<16x1xf32> to vector<16x512xf32>
    %68 = arith.mulf %67, %12 : vector<16x512xf32>
    %cst_31 = arith.constant dense<0.000000e+00> : vector<512xf32>
    %69 = vector.multi_reduction <add>, %68, %cst_31 [0] : vector<16x512xf32> to vector<512xf32>
    %70 = vector.shape_cast %69 : vector<512xf32> to vector<1x512xf32>
    %71 = arith.addf %66, %70 : vector<1x512xf32>
    %c0_32 = arith.constant 0 : index
    %c0_33 = arith.constant 0 : index
    %72 = vector.load %arg13[%c0_32, %c0_33] : memref<1x512xf32, #tpu.memory_space<vmem>>, vector<1x512xf32>
    tpu.vector_store %arg13[%c0_32, %c0_33], %71 {strides = array<i32>} : memref<1x512xf32, #tpu.memory_space<vmem>>, vector<1x512xf32>,
    %c0_34 = arith.constant 0 : index
    %c0_35 = arith.constant 0 : index
    %73 = vector.load %arg11[%c0_34, %c0_35] : memref<1x1xf32, #tpu.memory_space<vmem>>, vector<1x1xf32>
    tpu.vector_store %arg11[%c0_34, %c0_35], %44 {strides = array<i32>} : memref<1x1xf32, #tpu.memory_space<vmem>>, vector<1x1xf32>,
    %c0_i32_36 = arith.constant 0 : i32
    %74 = arith.cmpi eq, %arg1, %c0_i32_36 : i32
    %75 = arith.extui %74 : i1 to i32
    %c0_i32_37 = arith.constant 0 : i32
    %76 = arith.cmpi ne, %75, %c0_i32_37 : i32
    scf.if %76 {
      %c0_38 = arith.constant 0 : index
      %c0_39 = arith.constant 0 : index
      %77 = vector.load %arg11[%c0_38, %c0_39] : memref<1x1xf32, #tpu.memory_space<vmem>>, vector<1x1xf32>
      %c0_40 = arith.constant 0 : index
      %c0_41 = arith.constant 0 : index
      %c0_42 = arith.constant 0 : index
      %78 = vector.load %arg8[%c0_40, %c0_41, %c0_42] : memref<1x1x1xf32, #tpu.memory_space<vmem>>, vector<1x1x1xf32>
      %79 = vector.shape_cast %78 : vector<1x1x1xf32> to vector<1x1xf32>
      %80 = vector.shape_cast %77 : vector<1x1xf32> to vector<1x1x1xf32>
      tpu.vector_store %arg8[%c0_40, %c0_41, %c0_42], %80 {strides = array<i32>} : memref<1x1x1xf32, #tpu.memory_space<vmem>>, vector<1x1x1xf32>,
      %c0_43 = arith.constant 0 : index
      %c0_44 = arith.constant 0 : index
      %81 = vector.load %arg12[%c0_43, %c0_44] : memref<1x1xf32, #tpu.memory_space<vmem>>, vector<1x1xf32>
      %c0_45 = arith.constant 0 : index
      %c0_46 = arith.constant 0 : index
      %c0_47 = arith.constant 0 : index
      %82 = vector.load %arg9[%c0_45, %c0_46, %c0_47] : memref<1x1x1xf32, #tpu.memory_space<vmem>>, vector<1x1x1xf32>
      %83 = vector.shape_cast %82 : vector<1x1x1xf32> to vector<1x1xf32>
      %84 = vector.shape_cast %81 : vector<1x1xf32> to vector<1x1x1xf32>
      tpu.vector_store %arg9[%c0_45, %c0_46, %c0_47], %84 {strides = array<i32>} : memref<1x1x1xf32, #tpu.memory_space<vmem>>, vector<1x1x1xf32>,
      %c0_48 = arith.constant 0 : index
      %c0_49 = arith.constant 0 : index
      %85 = vector.load %arg13[%c0_48, %c0_49] : memref<1x512xf32, #tpu.memory_space<vmem>>, vector<1x512xf32>
      %c0_50 = arith.constant 0 : index
      %c0_51 = arith.constant 0 : index
      %c0_52 = arith.constant 0 : index
      %86 = vector.load %arg10[%c0_50, %c0_51, %c0_52] : memref<1x1x512xf32, #tpu.memory_space<vmem>>, vector<1x1x512xf32>
      %87 = vector.shape_cast %86 : vector<1x1x512xf32> to vector<1x512xf32>
      %88 = vector.shape_cast %85 : vector<1x512xf32> to vector<1x1x512xf32>
      tpu.vector_store %arg10[%c0_50, %c0_51, %c0_52], %88 {strides = array<i32>} : memref<1x1x512xf32, #tpu.memory_space<vmem>>, vector<1x1x512xf32>,
    } else {
    }
    return
  }
  func.func @transform_0(%arg0: i32, %arg1: i32, %arg2: memref<1xi32, #tpu.memory_space<smem>>) -> (i32, i32) {
    %c1_i32 = arith.constant 1 : i32
    %0 = arith.muli %arg0, %c1_i32 : i32
    %1 = arith.addi %0, %arg1 : i32
    %c0_i32 = arith.constant 0 : i32
    %c0_i32_0 = arith.constant 0 : i32
    return %1, %c0_i32 : i32, i32
  }
  func.func @transform_1(%arg0: i32, %arg1: i32, %arg2: memref<1xi32, #tpu.memory_space<smem>>) -> (i32, i32) {
    %c0_i32 = arith.constant 0 : i32
    %c0_i32_0 = arith.constant 0 : i32
    %c0_i32_1 = arith.constant 0 : i32
    return %c0_i32, %c0_i32_0 : i32, i32
  }
  func.func @transform_2(%arg0: i32, %arg1: i32, %arg2: memref<1xi32, #tpu.memory_space<smem>>) -> (i32, i32) {
    %c0_i32 = arith.constant 0 : i32
    %c0_i32_0 = arith.constant 0 : i32
    %c0_i32_1 = arith.constant 0 : i32
    return %c0_i32, %c0_i32_0 : i32, i32
  }
  func.func @transform_3(%arg0: i32, %arg1: i32, %arg2: memref<1xi32, #tpu.memory_space<smem>>) -> (i32, i32) {
    %c0_i32 = arith.constant 0 : i32
    %c0_i32_0 = arith.constant 0 : i32
    %c0_i32_1 = arith.constant 0 : i32
    return %c0_i32, %c0_i32_0 : i32, i32
  }
  func.func @transform_4(%arg0: i32, %arg1: i32, %arg2: memref<1xi32, #tpu.memory_space<smem>>) -> (i32, i32) {
    %c0_i32 = arith.constant 0 : i32
    %c0_i32_0 = arith.constant 0 : i32
    %c0_i32_1 = arith.constant 0 : i32
    return %c0_i32, %c0_i32_0 : i32, i32
  }
  func.func @transform_5(%arg0: i32, %arg1: i32, %arg2: memref<1xi32, #tpu.memory_space<smem>>) -> (i32, i32, i32) {
    %c0_i32 = arith.constant 0 : i32
    %c0_i32_0 = arith.constant 0 : i32
    %c0_i32_1 = arith.constant 0 : i32
    return %arg0, %c0_i32, %c0_i32_0 : i32, i32, i32
  }
  func.func @transform_6(%arg0: i32, %arg1: i32, %arg2: memref<1xi32, #tpu.memory_space<smem>>) -> (i32, i32, i32) {
    %c0_i32 = arith.constant 0 : i32
    %c0_i32_0 = arith.constant 0 : i32
    %c0_i32_1 = arith.constant 0 : i32
    return %arg0, %c0_i32, %c0_i32_0 : i32, i32, i32
  }
  func.func @transform_7(%arg0: i32, %arg1: i32, %arg2: memref<1xi32, #tpu.memory_space<smem>>) -> (i32, i32, i32) {
    %c0_i32 = arith.constant 0 : i32
    %c0_i32_0 = arith.constant 0 : i32
    %c0_i32_1 = arith.constant 0 : i32
    return %arg0, %c0_i32, %c0_i32_0 : i32, i32, i32
  }
}

</mosaic_0001>

<bundles_post_ra>
// kernel: tpu_custom_call.1
= control target key start
LH: loop header
LB: loop body
LE: loop exit
PB: predicated region body
PF: predicated region fallthrough
CT: control target
= control target key end

     0   :  { %15 = vsyncpa [#allocation8], 0  ;;  %s4007_s0 = inlined_call_operand.<no memory space> [shape: s32[1], index: 0, kind: input, shape index: {}]   ;;  %s4008_s1 = inlined_call_operand.hbm [shape: f32[16,1024], index: 1, kind: input, shape index: {}]   ;;  %s4009_s2 = inlined_call_operand.hbm [shape: bf16[1024,512], index: 2, kind: input, shape index: {}]   ;;  %s4010_s3 = inlined_call_operand.vmem [shape: f32[1,512], index: 3, kind: input, shape index: {}]   ;;  %s4011_s4 = inlined_call_operand.hbm [shape: bf16[512,256], index: 4, kind: input, shape index: {}]   ;;  %s4012_s5 = inlined_call_operand.vmem [shape: f32[1,128], index: 5, kind: input, shape index: {}]   ;;  %s4013_s6 = inlined_call_operand.hbm [shape: f32[1,1,1], index: 6, kind: output, shape index: {0}]   ;;  %s4014_s7 = inlined_call_operand.hbm [shape: f32[1,1,1], index: 7, kind: output, shape index: {1}]   ;;  %s4015_s8 = inlined_call_operand.hbm [shape: f32[1,1,512], index: 8, kind: output, shape index: {2}]  }
   0x1   :  { %16 = vsyncpa [#allocation11], 0 }
   0x2   :  { %17 = vsyncpa [#allocation9], 0 }
   0x3   :  { %18 = vsyncpa [#allocation15], 0  ;;  %s3739_s27 = smov [#allocation10]   ;;  %s3599_s9 = scalar_lea.hbm %s4009_s2, 32768 }
   0x4   :  { %s41_s28 = sshll.u32 %s3739_s27, 4  ;;  %p3600_p0 = scmp.ne.s32.totalorder %s4009_s2, %s3599_s9  ;;  %s42_s28 = int_to_ptr.vmem [resolvable:$true] %s41_s28 }
   0x5   :  { %p3603_p1 = scmp.lt.u32.totalorder %s3599_s9, %s4009_s2 }
   0x7   :  { %p3605_p2 = pnand %p3603_p1, %p3600_p0 }
   0x9   :  { %3608 = shalt.err (!%p3605_p2)
}
   0xa   :  { %s3609_s14 = scalar_lea.vmem %s42_s28, 32768  ;;  %p3614_p4 = scmp.lt.s32.totalorder %s42_s28, %s42_s28 }
   0xb   :  { %p3610_p3 = scmp.ne.s32.totalorder %s42_s28, %s3609_s14  ;;  %p3615_p5 = scmp.lt.s32.totalorder %s3609_s14, %s3609_s14 }
   0xd   :  { %p3616_p6 = por %p3615_p5, %p3614_p4 }
   0xf   :  { %p3617_p7 = pnand %p3616_p6, %p3610_p3 }
  0x11   :  { %3620 = shalt.err (!%p3617_p7)
}
  0x12   :  { %s3740_s15 = smov 256   ;;  %s3741_s16 = smov 16  }
  0x13   :  { %47 = dma.hbm_to_vmem [thread:$0]  %s4009_s2, 32768, %s42_s28, [#allocation11], %s3740_s15, %s3740_s15, %s3741_s16  }
  0x14   :  { %s3742_s19 = smov [#allocation7]   ;;  %s3621_s23 = scalar_lea.hbm %s4008_s1, 2048 }
  0x15   :  { %s29_s20 = sshll.u32 %s3742_s19, 4  ;;  %p3622_p8 = scmp.ne.s32.totalorder %s4008_s1, %s3621_s23  ;;  %s30_s20 = int_to_ptr.vmem [resolvable:$true] %s29_s20 }
  0x16   :  { %p3625_p9 = scmp.lt.u32.totalorder %s3621_s23, %s4008_s1 }
  0x18   :  { %p3627_p10 = pnand %p3625_p9, %p3622_p8 }
  0x1a   :  { %3630 = shalt.err (!%p3627_p10)
}
  0x1b   :  { %s3631_s29 = scalar_lea.vmem %s30_s20, 2048  ;;  %p3636_p12 = scmp.lt.s32.totalorder %s30_s20, %s30_s20 }
  0x1c   :  { %p3632_p11 = scmp.ne.s32.totalorder %s30_s20, %s3631_s29  ;;  %p3637_p13 = scmp.lt.s32.totalorder %s3631_s29, %s3631_s29 }
  0x1e   :  { %p3638_p0 = por %p3637_p13, %p3636_p12 }
  0x20   :  { %p3639_p1 = pnand %p3638_p0, %p3632_p11 }
  0x22   :  { %3642 = shalt.err (!%p3639_p1)
}
  0x23   :  { %s3743_s2 = smov 1024   ;;  %s3744_s28 = smov 64  }
  0x24   :  { %35 = dma.hbm_to_vmem [thread:$0]  %s4008_s1, 2048, %s30_s20, [#allocation8], %s3743_s2, %s3743_s2, %s3744_s28  }
  0x25   :  { %s3745_s10 = smov [#allocation12]   ;;  %s3643_s14 = scalar_lea.hbm %s4011_s4, 8192 }
  0x26   :  { %s55_s11 = sshll.u32 %s3745_s10, 4  ;;  %p3644_p2 = scmp.ne.s32.totalorder %s4011_s4, %s3643_s14  ;;  %s56_s11 = int_to_ptr.vmem [resolvable:$true] %s55_s11 }
  0x27   :  { %p3647_p3 = scmp.lt.u32.totalorder %s3643_s14, %s4011_s4 }
  0x29   :  { %p3649_p4 = pnand %p3647_p3, %p3644_p2 }
  0x2b   :  { %3652 = shalt.err (!%p3649_p4)
}
  0x2c   :  { %s3653_s19 = scalar_lea.vmem %s56_s11, 8192  ;;  %p3658_p6 = scmp.lt.s32.totalorder %s56_s11, %s56_s11 }
  0x2d   :  { %p3654_p5 = scmp.ne.s32.totalorder %s56_s11, %s3653_s19  ;;  %p3659_p7 = scmp.lt.s32.totalorder %s3653_s19, %s3653_s19 }
  0x2f   :  { %p3660_p8 = por %p3659_p7, %p3658_p6 }
  0x31   :  { %p3661_p9 = pnand %p3660_p8, %p3654_p5 }
  0x33   :  { %3664 = shalt.err (!%p3661_p9)
}
  0x34   :  { %s3746_s1 = smov 128   ;;  %s3747_s20 = smov 8  }
  0x35   :  { %61 = dma.hbm_to_vmem [thread:$0]  %s4011_s4, 8192, %s56_s11, [#allocation11], %s3746_s1, %s3746_s1, %s3747_s20  }
  0x36   :  { %3731 = dma.done.wait [#allocation8], 2048  }
  0x37   :  { %3732 = vsyncadd [#allocation8], 4294965248 }
  0x38   :  { %3733 = dma.done.wait [#allocation11], 40960  }
  0x39   :  { %3734 = vsyncadd [#allocation11], 4294926336  ;;  %v3105_v0 = vld [vmem:[#allocation10 + $0x4] ss:$16 sps:$4 sm:$0xff]   ;;  %v3109_v2 = vld [vmem:[#allocation10] ss:$16 sps:$4 sm:$0xff]  }
  0x3a   :  { %v3107_v1 = vld [vmem:[#allocation10 + $0x204] ss:$16 sps:$4 sm:$0xff]   ;;  %1670 = vmatprep.subr.bf16.mxu1 %v3105_v0  ;;  %v3110_v3 = vld [vmem:[#allocation10 + $0x200] ss:$16 sps:$4 sm:$0xff]   ;;  %v89_v46 = vld [vmem:[#allocation7 + $0x8] sm:$0xff]  ;;  %vm80_vm0 = vcmask 0  }
  0x3b   :  { %1713 = vmatprep.subr.bf16.mxu0 %v3107_v1  ;;  %v3111_v4 = vld [vmem:[#allocation10 + $0x24] ss:$16 sps:$4 sm:$0xff]   ;;  %1671 = vmatpush1.bf16.msra.mxu1 %v3109_v2  ;;  %v3115_v6 = vld [vmem:[#allocation10 + $0x20] ss:$16 sps:$4 sm:$0xff]   ;;  %v97_v49 = vld [vmem:[#allocation7 + $0x48] sm:$0xff]  ;;  %vm2570_vm5 = vcmask 7168  }
  0x3c   :  { %1714 = vmatpush1.bf16.msra.mxu0 %v3110_v3  ;;  %v3113_v5 = vld [vmem:[#allocation10 + $0x224] ss:$16 sps:$4 sm:$0xff]   ;;  %1672 = vmatprep.subr.bf16.mxu1 %v3111_v4  ;;  %v3116_v7 = vld [vmem:[#allocation10 + $0x220] ss:$16 sps:$4 sm:$0xff]   ;;  %v3836_v50 = vpack.c.bf16 %v97_v49, %v89_v46  ;;  %v91_v51 = vld [vmem:[#allocation7 + $0x18] sm:$0xff]  ;;  %s3752_s27 = smov [#allocation13]  }
  0x3d   :  { %1715 = vmatprep.subr.bf16.mxu0 %v3113_v5  ;;  %v3117_v8 = vld [vmem:[#allocation10 + $0x44] ss:$16 sps:$4 sm:$0xff]   ;;  %v3121_v10 = vld [vmem:[#allocation10 + $0x40] ss:$16 sps:$4 sm:$0xff]   ;;  %v99_v52 = vld [vmem:[#allocation7 + $0x58] sm:$0xff]  ;;  %s2691_s29 = sshll.u32 %s3752_s27, 4  ;;  %s2692_s29 = int_to_ptr.vmem [resolvable:$true] %s2691_s29 }
  0x3e   :  { %v3119_v9 = vld [vmem:[#allocation10 + $0x244] ss:$16 sps:$4 sm:$0xff]   ;;  %v3122_v11 = vld [vmem:[#allocation10 + $0x240] ss:$16 sps:$4 sm:$0xff]   ;;  %v3838_v55 = vpack.c.bf16 %v99_v52, %v91_v51  ;;  %1702 = vmatprep.mubr.bf16.mxu1 %v3836_v50  ;;  %v3246_v46 = vld [vmem:[#allocation10 + $0xe8] ss:$16 sps:$4 sm:$0xff]  }
  0x3f   :  { %1673 = vmatpush1.bf16.msra.mxu1 %v3115_v6  ;;  %v3123_v12 = vld [vmem:[#allocation10 + $0x64] ss:$16 sps:$4 sm:$0xff]   ;;  %v3127_v14 = vld [vmem:[#allocation10 + $0x60] ss:$16 sps:$4 sm:$0xff]   ;;  %v3260_v52 = vld [vmem:[#allocation10 + $0x12c] ss:$16 sps:$4 sm:$0xff]  }
  0x40   :  { %1716 = vmatpush1.bf16.msra.mxu0 %v3116_v7  ;;  %1674 = vmatprep.subr.bf16.mxu1 %v3117_v8  ;;  %v3125_v13 = vld [vmem:[#allocation10 + $0x264] ss:$16 sps:$4 sm:$0xff]   ;;  %v3128_v15 = vld [vmem:[#allocation10 + $0x260] ss:$16 sps:$4 sm:$0xff]  }
  0x41   :  { %1717 = vmatprep.subr.bf16.mxu0 %v3119_v9  ;;  %v3129_v16 = vld [vmem:[#allocation10 + $0x84] ss:$16 sps:$4 sm:$0xff]   ;;  %v3133_v18 = vld [vmem:[#allocation10 + $0x80] ss:$16 sps:$4 sm:$0xff]   ;;  %1745 = vmatprep.mubr.bf16.mxu0 %v3838_v55 }
  0x42   :  { %v3131_v17 = vld [vmem:[#allocation10 + $0x284] ss:$16 sps:$4 sm:$0xff]   ;;  %v3134_v19 = vld [vmem:[#allocation10 + $0x280] ss:$16 sps:$4 sm:$0xff]  }
  0x43   :  { %1675 = vmatpush1.bf16.msra.mxu1 %v3121_v10  ;;  %v3135_v20 = vld [vmem:[#allocation10 + $0xa4] ss:$16 sps:$4 sm:$0xff]   ;;  %v3139_v22 = vld [vmem:[#allocation10 + $0xa0] ss:$16 sps:$4 sm:$0xff]  }
  0x44   :  { %1718 = vmatpush1.bf16.msra.mxu0 %v3122_v11  ;;  %1676 = vmatprep.subr.bf16.mxu1 %v3123_v12  ;;  %v3137_v21 = vld [vmem:[#allocation10 + $0x2a4] ss:$16 sps:$4 sm:$0xff]   ;;  %v3140_v23 = vld [vmem:[#allocation10 + $0x2a0] ss:$16 sps:$4 sm:$0xff]   ;;  %v3206_v11 = vld [vmem:[#allocation10 + $0xc] ss:$16 sps:$4 sm:$0xff]  }
  0x45   :  { %1719 = vmatprep.subr.bf16.mxu0 %v3125_v13  ;;  %v3141_v24 = vld [vmem:[#allocation10 + $0xc4] ss:$16 sps:$4 sm:$0xff]   ;;  %v3145_v26 = vld [vmem:[#allocation10 + $0xc0] ss:$16 sps:$4 sm:$0xff]  }
  0x46   :  { %v3143_v25 = vld [vmem:[#allocation10 + $0x2c4] ss:$16 sps:$4 sm:$0xff]   ;;  %v3146_v27 = vld [vmem:[#allocation10 + $0x2c0] ss:$16 sps:$4 sm:$0xff]  }
  0x47   :  { %1677 = vmatpush1.bf16.msra.mxu1 %v3127_v14  ;;  %v3147_v28 = vld [vmem:[#allocation10 + $0xe4] ss:$16 sps:$4 sm:$0xff]   ;;  %v3151_v30 = vld [vmem:[#allocation10 + $0xe0] ss:$16 sps:$4 sm:$0xff]   ;;  %v3204_v14 = vld [vmem:[#allocation10 + $0x8] ss:$16 sps:$4 sm:$0xff]  }
  0x48   :  { %1720 = vmatpush1.bf16.msra.mxu0 %v3128_v15  ;;  %1678 = vmatprep.subr.bf16.mxu1 %v3129_v16  ;;  %v3149_v29 = vld [vmem:[#allocation10 + $0x2e4] ss:$16 sps:$4 sm:$0xff]   ;;  %v3152_v31 = vld [vmem:[#allocation10 + $0x2e0] ss:$16 sps:$4 sm:$0xff]  }
  0x49   :  { %1721 = vmatprep.subr.bf16.mxu0 %v3131_v17  ;;  %v3153_v32 = vld [vmem:[#allocation10 + $0x104] ss:$16 sps:$4 sm:$0xff]   ;;  %v3157_v34 = vld [vmem:[#allocation10 + $0x100] ss:$16 sps:$4 sm:$0xff]   ;;  %v3212_v17 = vld [vmem:[#allocation10 + $0x2c] ss:$16 sps:$4 sm:$0xff]  }
  0x4a   :  { %v3155_v33 = vld [vmem:[#allocation10 + $0x304] ss:$16 sps:$4 sm:$0xff]   ;;  %v3158_v35 = vld [vmem:[#allocation10 + $0x300] ss:$16 sps:$4 sm:$0xff]  }
  0x4b   :  { %1679 = vmatpush1.bf16.msra.mxu1 %v3133_v18  ;;  %v3159_v36 = vld [vmem:[#allocation10 + $0x124] ss:$16 sps:$4 sm:$0xff]   ;;  %v3163_v38 = vld [vmem:[#allocation10 + $0x120] ss:$16 sps:$4 sm:$0xff]  }
  0x4c   :  { %1722 = vmatpush1.bf16.msra.mxu0 %v3134_v19  ;;  %1680 = vmatprep.subr.bf16.mxu1 %v3135_v20  ;;  %v3161_v37 = vld [vmem:[#allocation10 + $0x324] ss:$16 sps:$4 sm:$0xff]   ;;  %v3164_v39 = vld [vmem:[#allocation10 + $0x320] ss:$16 sps:$4 sm:$0xff]   ;;  %v3210_v19 = vld [vmem:[#allocation10 + $0x28] ss:$16 sps:$4 sm:$0xff]  }
  0x4d   :  { %1723 = vmatprep.subr.bf16.mxu0 %v3137_v21  ;;  %v3165_v40 = vld [vmem:[#allocation10 + $0x144] ss:$16 sps:$4 sm:$0xff]   ;;  %v3169_v42 = vld [vmem:[#allocation10 + $0x140] ss:$16 sps:$4 sm:$0xff]   ;;  %v3218_v21 = vld [vmem:[#allocation10 + $0x4c] ss:$16 sps:$4 sm:$0xff]  }
  0x4e   :  { %v3167_v41 = vld [vmem:[#allocation10 + $0x344] ss:$16 sps:$4 sm:$0xff]   ;;  %v3170_v43 = vld [vmem:[#allocation10 + $0x340] ss:$16 sps:$4 sm:$0xff]  }
  0x4f   :  { %1681 = vmatpush1.bf16.msra.mxu1 %v3139_v22  ;;  %v3171_v44 = vld [vmem:[#allocation10 + $0x164] ss:$16 sps:$4 sm:$0xff]   ;;  %v3175_v47 = vld [vmem:[#allocation10 + $0x160] ss:$16 sps:$4 sm:$0xff]  }
  0x50   :  { %1724 = vmatpush1.bf16.msra.mxu0 %v3140_v23  ;;  %1682 = vmatprep.subr.bf16.mxu1 %v3141_v24  ;;  %v3173_v45 = vld [vmem:[#allocation10 + $0x364] ss:$16 sps:$4 sm:$0xff]   ;;  %v3176_v48 = vld [vmem:[#allocation10 + $0x360] ss:$16 sps:$4 sm:$0xff]   ;;  %v3216_v23 = vld [vmem:[#allocation10 + $0x48] ss:$16 sps:$4 sm:$0xff]  }
  0x51   :  { %1725 = vmatprep.subr.bf16.mxu0 %v3143_v25  ;;  %v3177_v53 = vld [vmem:[#allocation10 + $0x184] ss:$16 sps:$4 sm:$0xff]   ;;  %v3181_v56 = vld [vmem:[#allocation10 + $0x180] ss:$16 sps:$4 sm:$0xff]   ;;  %v3224_v25 = vld [vmem:[#allocation10 + $0x6c] ss:$16 sps:$4 sm:$0xff]  }
  0x52   :  { %v3179_v54 = vld [vmem:[#allocation10 + $0x384] ss:$16 sps:$4 sm:$0xff]   ;;  %v3182_v57 = vld [vmem:[#allocation10 + $0x380] ss:$16 sps:$4 sm:$0xff]  }
  0x53   :  { %1683 = vmatpush1.bf16.msra.mxu1 %v3145_v26  ;;  %v3183_v58 = vld [vmem:[#allocation10 + $0x1a4] ss:$16 sps:$4 sm:$0xff]   ;;  %v3187_v60 = vld [vmem:[#allocation10 + $0x1a0] ss:$16 sps:$4 sm:$0xff]  }
  0x54   :  { %1726 = vmatpush1.bf16.msra.mxu0 %v3146_v27  ;;  %1684 = vmatprep.subr.bf16.mxu1 %v3147_v28  ;;  %v3185_v59 = vld [vmem:[#allocation10 + $0x3a4] ss:$16 sps:$4 sm:$0xff]   ;;  %v3188_v61 = vld [vmem:[#allocation10 + $0x3a0] ss:$16 sps:$4 sm:$0xff]   ;;  %v3222_v27 = vld [vmem:[#allocation10 + $0x68] ss:$16 sps:$4 sm:$0xff]  }
  0x55   :  { %1727 = vmatprep.subr.bf16.mxu0 %v3149_v29  ;;  %v3189_v62 = vld [vmem:[#allocation10 + $0x1c4] ss:$16 sps:$4 sm:$0xff]   ;;  %v3193_v0 = vld [vmem:[#allocation10 + $0x1c0] ss:$16 sps:$4 sm:$0xff]   ;;  %v3230_v29 = vld [vmem:[#allocation10 + $0x8c] ss:$16 sps:$4 sm:$0xff]  }
  0x56   :  { %v3191_v63 = vld [vmem:[#allocation10 + $0x3c4] ss:$16 sps:$4 sm:$0xff]   ;;  %v3194_v1 = vld [vmem:[#allocation10 + $0x3c0] ss:$16 sps:$4 sm:$0xff]  }
  0x57   :  { %1685 = vmatpush1.bf16.msra.mxu1 %v3151_v30  ;;  %v3195_v2 = vld [vmem:[#allocation10 + $0x1e4] ss:$16 sps:$4 sm:$0xff]   ;;  %v3199_v4 = vld [vmem:[#allocation10 + $0x1e0] ss:$16 sps:$4 sm:$0xff]  }
  0x58   :  { %1728 = vmatpush1.bf16.msra.mxu0 %v3152_v31  ;;  %1686 = vmatprep.subr.bf16.mxu1 %v3153_v32  ;;  %v3197_v3 = vld [vmem:[#allocation10 + $0x3e4] ss:$16 sps:$4 sm:$0xff]   ;;  %v3200_v5 = vld [vmem:[#allocation10 + $0x3e0] ss:$16 sps:$4 sm:$0xff]   ;;  %v3228_v31 = vld [vmem:[#allocation10 + $0x88] ss:$16 sps:$4 sm:$0xff]  }
  0x59   :  { %1729 = vmatprep.subr.bf16.mxu0 %v3155_v33  ;;  %v88_v6 = vld [vmem:[#allocation7] sm:$0xff]  ;;  %v90_v9 = vld [vmem:[#allocation7 + $0x10] sm:$0xff]  ;;  %v3236_v33 = vld [vmem:[#allocation10 + $0xac] ss:$16 sps:$4 sm:$0xff]  }
  0x5a   :  { %v96_v7 = vld [vmem:[#allocation7 + $0x40] sm:$0xff]  ;;  %v98_v10 = vld [vmem:[#allocation7 + $0x50] sm:$0xff] }
  0x5b   :  { %1687 = vmatpush1.bf16.msra.mxu1 %v3157_v34  ;;  %v3203_v8 = vld [vmem:[#allocation10 + $0x404] ss:$16 sps:$4 sm:$0xff]   ;;  %v3842_v12 = vpack.c.bf16 %v96_v7, %v88_v6  ;;  %v3201_v13 = vld [vmem:[#allocation10 + $0x400] ss:$16 sps:$4 sm:$0xff]   ;;  %v3844_v15 = vpack.c.bf16 %v98_v10, %v90_v9  ;;  %v3282_v7 = vld [vmem:[#allocation10 + $0x1a8] ss:$16 sps:$4 sm:$0xff]  }
  0x5c   :  { %1730 = vmatpush1.bf16.msra.mxu0 %v3158_v35  ;;  %1688 = vmatprep.subr.bf16.mxu1 %v3159_v36  ;;  %v3209_v16 = vld [vmem:[#allocation10 + $0x424] ss:$16 sps:$4 sm:$0xff]   ;;  %v3207_v18 = vld [vmem:[#allocation10 + $0x420] ss:$16 sps:$4 sm:$0xff]   ;;  %v3234_v35 = vld [vmem:[#allocation10 + $0xa8] ss:$16 sps:$4 sm:$0xff]  }
  0x5d   :  { %1731 = vmatprep.subr.bf16.mxu0 %v3161_v37  ;;  %v3215_v20 = vld [vmem:[#allocation10 + $0x444] ss:$16 sps:$4 sm:$0xff]   ;;  %v3213_v22 = vld [vmem:[#allocation10 + $0x440] ss:$16 sps:$4 sm:$0xff]   ;;  %v3242_v37 = vld [vmem:[#allocation10 + $0xcc] ss:$16 sps:$4 sm:$0xff]  }
  0x5e   :  { %v3221_v24 = vld [vmem:[#allocation10 + $0x464] ss:$16 sps:$4 sm:$0xff]   ;;  %v3219_v26 = vld [vmem:[#allocation10 + $0x460] ss:$16 sps:$4 sm:$0xff]   ;;  %v3290_v9 = vld [vmem:[#allocation10 + $0x1cc] ss:$16 sps:$4 sm:$0xff]  }
  0x5f   :  { %1689 = vmatpush1.bf16.msra.mxu1 %v3163_v38  ;;  %v3227_v28 = vld [vmem:[#allocation10 + $0x484] ss:$16 sps:$4 sm:$0xff]   ;;  %v3225_v30 = vld [vmem:[#allocation10 + $0x480] ss:$16 sps:$4 sm:$0xff]  }
  0x60   :  { %1732 = vmatpush1.bf16.msra.mxu0 %v3164_v39  ;;  %1690 = vmatprep.subr.bf16.mxu1 %v3165_v40  ;;  %v3233_v32 = vld [vmem:[#allocation10 + $0x4a4] ss:$16 sps:$4 sm:$0xff]   ;;  %v3231_v34 = vld [vmem:[#allocation10 + $0x4a0] ss:$16 sps:$4 sm:$0xff]   ;;  %v3240_v39 = vld [vmem:[#allocation10 + $0xc8] ss:$16 sps:$4 sm:$0xff]  }
  0x61   :  { %1733 = vmatprep.subr.bf16.mxu0 %v3167_v41  ;;  %v3239_v36 = vld [vmem:[#allocation10 + $0x4c4] ss:$16 sps:$4 sm:$0xff]   ;;  %v3237_v38 = vld [vmem:[#allocation10 + $0x4c0] ss:$16 sps:$4 sm:$0xff]   ;;  %v93_v40 = vld [vmem:[#allocation7 + $0x28] sm:$0xff] }
  0x62   :  { %v101_v41 = vld [vmem:[#allocation7 + $0x68] sm:$0xff]  ;;  %v3249_v49 = vld [vmem:[#allocation10 + $0x500] ss:$16 sps:$4 sm:$0xff]   ;;  %v3257_v51 = vld [vmem:[#allocation10 + $0x524] ss:$16 sps:$4 sm:$0xff]  }
  0x63   :  { %1691 = vmatpush1.bf16.msra.mxu1 %v3169_v42  ;;  %v3245_v42 = vld [vmem:[#allocation10 + $0x4e4] ss:$16 sps:$4 sm:$0xff]   ;;  %v3279_v6 = vld [vmem:[#allocation10 + $0x5a0] ss:$16 sps:$4 sm:$0xff]  }
  0x64   :  { %1734 = vmatpush1.bf16.msra.mxu0 %v3170_v43  ;;  %1692 = vmatprep.subr.bf16.mxu1 %v3171_v44  ;;  %v3248_v43 = vld [vmem:[#allocation10 + $0xec] ss:$16 sps:$4 sm:$0xff]   ;;  %v3849_v44 = vpack.c.bf16 %v101_v41, %v93_v40  ;;  %v3285_v10 = vld [vmem:[#allocation10 + $0x5c0] ss:$16 sps:$4 sm:$0xff]  }
  0x65   :  { %1735 = vmatprep.subr.bf16.mxu0 %v3173_v45  ;;  %v3243_v45 = vld [vmem:[#allocation10 + $0x4e0] ss:$16 sps:$4 sm:$0xff]   ;;  %v3326_v40 = vld [vmem:[#allocation10 + $0x28c] ss:$16 sps:$4 sm:$0xff]  }
  0x66   :  { %v3321_v41 = vld [vmem:[#allocation10 + $0x680] ss:$16 sps:$4 sm:$0xff]  }
  0x67   :  { %1693 = vmatpush1.bf16.msra.mxu1 %v3175_v47  ;;  %v3251_v47 = vld [vmem:[#allocation10 + $0x504] ss:$16 sps:$4 sm:$0xff]  }
  0x68   :  { %1736 = vmatpush1.bf16.msra.mxu0 %v3176_v48  ;;  %1694 = vmatprep.subr.bf16.mxu1 %v3177_v53  ;;  %v3254_v48 = vld [vmem:[#allocation10 + $0x10c] ss:$16 sps:$4 sm:$0xff]   ;;  %v3255_v53 = vld [vmem:[#allocation10 + $0x520] ss:$16 sps:$4 sm:$0xff]  }
  0x69   :  { %1737 = vmatprep.subr.bf16.mxu0 %v3179_v54  ;;  %v3258_v54 = vld [vmem:[#allocation10 + $0x128] ss:$16 sps:$4 sm:$0xff]  }
  0x6b   :  { %1695 = vmatpush1.bf16.msra.mxu1 %v3181_v56  ;;  %v3263_v56 = vld [vmem:[#allocation10 + $0x544] ss:$16 sps:$4 sm:$0xff]  }
  0x6c   :  { %1738 = vmatpush1.bf16.msra.mxu0 %v3182_v57  ;;  %1696 = vmatprep.subr.bf16.mxu1 %v3183_v58  ;;  %v3266_v57 = vld [vmem:[#allocation10 + $0x14c] ss:$16 sps:$4 sm:$0xff]   ;;  %v3261_v58 = vld [vmem:[#allocation10 + $0x540] ss:$16 sps:$4 sm:$0xff]  }
  0x6d   :  { %1739 = vmatprep.subr.bf16.mxu0 %v3185_v59  ;;  %v3264_v59 = vld [vmem:[#allocation10 + $0x148] ss:$16 sps:$4 sm:$0xff]  }
  0x6f   :  { %1697 = vmatpush1.bf16.msra.mxu1 %v3187_v60  ;;  %v3269_v60 = vld [vmem:[#allocation10 + $0x564] ss:$16 sps:$4 sm:$0xff]  }
  0x70   :  { %1740 = vmatpush1.bf16.msra.mxu0 %v3188_v61  ;;  %1698 = vmatprep.subr.bf16.mxu1 %v3189_v62  ;;  %v3272_v61 = vld [vmem:[#allocation10 + $0x16c] ss:$16 sps:$4 sm:$0xff]   ;;  %v3267_v62 = vld [vmem:[#allocation10 + $0x560] ss:$16 sps:$4 sm:$0xff]  }
  0x71   :  { %1741 = vmatprep.subr.bf16.mxu0 %v3191_v63  ;;  %v3270_v63 = vld [vmem:[#allocation10 + $0x168] ss:$16 sps:$4 sm:$0xff]  }
  0x73   :  { %1699 = vmatpush1.bf16.msra.mxu1 %v3193_v0  ;;  %v3275_v0 = vld [vmem:[#allocation10 + $0x584] ss:$16 sps:$4 sm:$0xff]  }
  0x74   :  { %1742 = vmatpush1.bf16.msra.mxu0 %v3194_v1  ;;  %1700 = vmatprep.subr.bf16.mxu1 %v3195_v2  ;;  %v3278_v1 = vld [vmem:[#allocation10 + $0x18c] ss:$16 sps:$4 sm:$0xff]   ;;  %v3273_v2 = vld [vmem:[#allocation10 + $0x580] ss:$16 sps:$4 sm:$0xff]  }
  0x75   :  { %1743 = vmatprep.subr.bf16.mxu0 %v3197_v3  ;;  %v3276_v3 = vld [vmem:[#allocation10 + $0x188] ss:$16 sps:$4 sm:$0xff]  }
  0x77   :  { %1701 = vmatpush1.bf16.msra.mxu1 %v3199_v4  ;;  %v3281_v4 = vld [vmem:[#allocation10 + $0x5a4] ss:$16 sps:$4 sm:$0xff]  }
  0x78   :  { %1744 = vmatpush1.bf16.msra.mxu0 %v3200_v5  ;;  %1842 = vmatprep.subr.bf16.mxu1 %v3206_v11  ;;  %v3284_v5 = vld [vmem:[#allocation10 + $0x1ac] ss:$16 sps:$4 sm:$0xff]   ;;  %v3288_v11 = vld [vmem:[#allocation10 + $0x1c8] ss:$16 sps:$4 sm:$0xff]  }
  0x79   :  { %1756 = vmatprep.subr.bf16.mxu0 %v3203_v8  ;;  %v3287_v8 = vld [vmem:[#allocation10 + $0x5c4] ss:$16 sps:$4 sm:$0xff]  }
  0x7a   :  { %1703 = vmatmul.mubr.bf16.vlgmr.msra.gmra.mrb[0].mxu1 %v3842_v12 }
  0x7b   :  { %1746 = vmatmul.mubr.bf16.vlgmr.msra.gmra.mrb[0].mxu0 %v3844_v15  ;;  %1843 = vmatpush1.bf16.msra.mxu1 %v3204_v14  ;;  %v3296_v14 = vld [vmem:[#allocation10 + $0x1ec] ss:$16 sps:$4 sm:$0xff]  }
  0x7c   :  { %1757 = vmatpush1.bf16.msra.mxu0 %v3201_v13  ;;  %1844 = vmatprep.subr.bf16.mxu1 %v3212_v17  ;;  %v3293_v13 = vld [vmem:[#allocation10 + $0x5e4] ss:$16 sps:$4 sm:$0xff]   ;;  %v3294_v17 = vld [vmem:[#allocation10 + $0x1e8] ss:$16 sps:$4 sm:$0xff]  }
  0x7d   :  { %1758 = vmatprep.subr.bf16.mxu0 %v3209_v16  ;;  %1874 = vmatprep.mubr.bf16.mxu1 %v3836_v50  ;;  %v3252_v50 = vld [vmem:[#allocation10 + $0x108] ss:$16 sps:$4 sm:$0xff]   ;;  %v3291_v16 = vld [vmem:[#allocation10 + $0x5e0] ss:$16 sps:$4 sm:$0xff]  }
  0x7e   :  { %1788 = vmatprep.mubr.bf16.mxu0 %v3849_v44 }
  0x7f   :  { %1845 = vmatpush1.bf16.msra.mxu1 %v3210_v19  ;;  %v92_v19 = vld [vmem:[#allocation7 + $0x20] sm:$0xff] }
  0x80   :  { %1759 = vmatpush1.bf16.msra.mxu0 %v3207_v18  ;;  %1846 = vmatprep.subr.bf16.mxu1 %v3218_v21  ;;  %v3299_v18 = vld [vmem:[#allocation10 + $0x604] ss:$16 sps:$4 sm:$0xff]   ;;  %v3302_v21 = vld [vmem:[#allocation10 + $0x20c] ss:$16 sps:$4 sm:$0xff]  }
  0x81   :  { %1760 = vmatprep.subr.bf16.mxu0 %v3215_v20  ;;  %v100_v20 = vld [vmem:[#allocation7 + $0x60] sm:$0xff] }
  0x83   :  { %1847 = vmatpush1.bf16.msra.mxu1 %v3216_v23  ;;  %v3300_v23 = vld [vmem:[#allocation10 + $0x208] ss:$16 sps:$4 sm:$0xff]  }
  0x84   :  { %1761 = vmatpush1.bf16.msra.mxu0 %v3213_v22  ;;  %1848 = vmatprep.subr.bf16.mxu1 %v3224_v25  ;;  %v3297_v22 = vld [vmem:[#allocation10 + $0x600] ss:$16 sps:$4 sm:$0xff]   ;;  %v3305_v25 = vld [vmem:[#allocation10 + $0x624] ss:$16 sps:$4 sm:$0xff]  }
  0x85   :  { %1762 = vmatprep.subr.bf16.mxu0 %v3221_v24  ;;  %v3852_v24 = vpack.c.bf16 %v100_v20, %v92_v19  ;;  %v3386_v19 = vld [vmem:[#allocation10 + $0x3cc] ss:$16 sps:$4 sm:$0xff]   ;;  %v3381_v20 = vld [vmem:[#allocation10 + $0x7c0] ss:$16 sps:$4 sm:$0xff]  }
  0x87   :  { %1849 = vmatpush1.bf16.msra.mxu1 %v3222_v27  ;;  %v3303_v27 = vld [vmem:[#allocation10 + $0x620] ss:$16 sps:$4 sm:$0xff]  }
  0x88   :  { %1763 = vmatpush1.bf16.msra.mxu0 %v3219_v26  ;;  %1850 = vmatprep.subr.bf16.mxu1 %v3230_v29  ;;  %v3308_v26 = vld [vmem:[#allocation10 + $0x22c] ss:$16 sps:$4 sm:$0xff]   ;;  %v3311_v29 = vld [vmem:[#allocation10 + $0x644] ss:$16 sps:$4 sm:$0xff]  }
  0x89   :  { %1764 = vmatprep.subr.bf16.mxu0 %v3227_v28  ;;  %v3306_v28 = vld [vmem:[#allocation10 + $0x228] ss:$16 sps:$4 sm:$0xff]  }
  0x8b   :  { %1851 = vmatpush1.bf16.msra.mxu1 %v3228_v31  ;;  %v103_v31 = vld [vmem:[#allocation7 + $0x78] sm:$0xff] }
  0x8c   :  { %1765 = vmatpush1.bf16.msra.mxu0 %v3225_v30  ;;  %1852 = vmatprep.subr.bf16.mxu1 %v3236_v33  ;;  %v95_v30 = vld [vmem:[#allocation7 + $0x38] sm:$0xff] }
  0x8d   :  { %1766 = vmatprep.subr.bf16.mxu0 %v3233_v32  ;;  %v3314_v32 = vld [vmem:[#allocation10 + $0x24c] ss:$16 sps:$4 sm:$0xff]   ;;  %v3856_v33 = vpack.c.bf16 %v103_v31, %v95_v30  ;;  %v3393_v30 = vld [vmem:[#allocation10 + $0x408] ss:$16 sps:$4 sm:$0xff]  }
  0x8f   :  { %1853 = vmatpush1.bf16.msra.mxu1 %v3234_v35  ;;  %v3312_v35 = vld [vmem:[#allocation10 + $0x248] ss:$16 sps:$4 sm:$0xff]  }
  0x90   :  { %1767 = vmatpush1.bf16.msra.mxu0 %v3231_v34  ;;  %1854 = vmatprep.subr.bf16.mxu1 %v3242_v37  ;;  %v3309_v34 = vld [vmem:[#allocation10 + $0x640] ss:$16 sps:$4 sm:$0xff]  }
  0x91   :  { %1768 = vmatprep.subr.bf16.mxu0 %v3239_v36  ;;  %v3320_v36 = vld [vmem:[#allocation10 + $0x26c] ss:$16 sps:$4 sm:$0xff]   ;;  %v3315_v37 = vld [vmem:[#allocation10 + $0x660] ss:$16 sps:$4 sm:$0xff]  }
  0x93   :  { %1855 = vmatpush1.bf16.msra.mxu1 %v3240_v39  ;;  %v3323_v39 = vld [vmem:[#allocation10 + $0x684] ss:$16 sps:$4 sm:$0xff]  }
  0x94   :  { %1769 = vmatpush1.bf16.msra.mxu0 %v3237_v38  ;;  %1856 = vmatprep.subr.bf16.mxu1 %v3248_v43  ;;  %v3318_v38 = vld [vmem:[#allocation10 + $0x268] ss:$16 sps:$4 sm:$0xff]   ;;  %v3332_v43 = vld [vmem:[#allocation10 + $0x2ac] ss:$16 sps:$4 sm:$0xff]  }
  0x95   :  { %1770 = vmatprep.subr.bf16.mxu0 %v3245_v42  ;;  %v3329_v42 = vld [vmem:[#allocation10 + $0x6a4] ss:$16 sps:$4 sm:$0xff]  }
  0x97   :  { %1857 = vmatpush1.bf16.msra.mxu1 %v3246_v46  ;;  %v3330_v46 = vld [vmem:[#allocation10 + $0x2a8] ss:$16 sps:$4 sm:$0xff]  }
  0x98   :  { %1771 = vmatpush1.bf16.msra.mxu0 %v3243_v45  ;;  %1858 = vmatprep.subr.bf16.mxu1 %v3254_v48  ;;  %v3327_v45 = vld [vmem:[#allocation10 + $0x6a0] ss:$16 sps:$4 sm:$0xff]   ;;  %v3338_v48 = vld [vmem:[#allocation10 + $0x2cc] ss:$16 sps:$4 sm:$0xff]  }
  0x99   :  { %1772 = vmatprep.subr.bf16.mxu0 %v3251_v47  ;;  %v3335_v47 = vld [vmem:[#allocation10 + $0x6c4] ss:$16 sps:$4 sm:$0xff]  }
  0x9b   :  { %1859 = vmatpush1.bf16.msra.mxu1 %v3252_v50  ;;  %v3336_v50 = vld [vmem:[#allocation10 + $0x2c8] ss:$16 sps:$4 sm:$0xff]  }
  0x9c   :  { %1773 = vmatpush1.bf16.msra.mxu0 %v3249_v49  ;;  %1860 = vmatprep.subr.bf16.mxu1 %v3260_v52  ;;  %v3333_v49 = vld [vmem:[#allocation10 + $0x6c0] ss:$16 sps:$4 sm:$0xff]   ;;  %v3344_v52 = vld [vmem:[#allocation10 + $0x2ec] ss:$16 sps:$4 sm:$0xff]  }
  0x9d   :  { %1774 = vmatprep.subr.bf16.mxu0 %v3257_v51  ;;  %v3341_v51 = vld [vmem:[#allocation10 + $0x6e4] ss:$16 sps:$4 sm:$0xff]  }
  0x9f   :  { %1861 = vmatpush1.bf16.msra.mxu1 %v3258_v54  ;;  %v3342_v54 = vld [vmem:[#allocation10 + $0x2e8] ss:$16 sps:$4 sm:$0xff]  }
  0xa0   :  { %1775 = vmatpush1.bf16.msra.mxu0 %v3255_v53  ;;  %1862 = vmatprep.subr.bf16.mxu1 %v3266_v57  ;;  %v3339_v53 = vld [vmem:[#allocation10 + $0x6e0] ss:$16 sps:$4 sm:$0xff]   ;;  %v3350_v57 = vld [vmem:[#allocation10 + $0x30c] ss:$16 sps:$4 sm:$0xff]  }
  0xa1   :  { %1776 = vmatprep.subr.bf16.mxu0 %v3263_v56  ;;  %v3347_v56 = vld [vmem:[#allocation10 + $0x704] ss:$16 sps:$4 sm:$0xff]  }
  0xa3   :  { %1863 = vmatpush1.bf16.msra.mxu1 %v3264_v59  ;;  %v3348_v59 = vld [vmem:[#allocation10 + $0x308] ss:$16 sps:$4 sm:$0xff]  }
  0xa4   :  { %1777 = vmatpush1.bf16.msra.mxu0 %v3261_v58  ;;  %1864 = vmatprep.subr.bf16.mxu1 %v3272_v61  ;;  %v3345_v58 = vld [vmem:[#allocation10 + $0x700] ss:$16 sps:$4 sm:$0xff]   ;;  %v3356_v61 = vld [vmem:[#allocation10 + $0x32c] ss:$16 sps:$4 sm:$0xff]  }
  0xa5   :  { %1778 = vmatprep.subr.bf16.mxu0 %v3269_v60  ;;  %v3353_v60 = vld [vmem:[#allocation10 + $0x724] ss:$16 sps:$4 sm:$0xff]  }
  0xa7   :  { %1865 = vmatpush1.bf16.msra.mxu1 %v3270_v63  ;;  %v3354_v63 = vld [vmem:[#allocation10 + $0x328] ss:$16 sps:$4 sm:$0xff]  }
  0xa8   :  { %1779 = vmatpush1.bf16.msra.mxu0 %v3267_v62  ;;  %1866 = vmatprep.subr.bf16.mxu1 %v3278_v1  ;;  %v3351_v62 = vld [vmem:[#allocation10 + $0x720] ss:$16 sps:$4 sm:$0xff]   ;;  %v3362_v1 = vld [vmem:[#allocation10 + $0x34c] ss:$16 sps:$4 sm:$0xff]  }
  0xa9   :  { %1780 = vmatprep.subr.bf16.mxu0 %v3275_v0  ;;  %v3359_v0 = vld [vmem:[#allocation10 + $0x744] ss:$16 sps:$4 sm:$0xff]  }
  0xab   :  { %1867 = vmatpush1.bf16.msra.mxu1 %v3276_v3  ;;  %v3360_v3 = vld [vmem:[#allocation10 + $0x348] ss:$16 sps:$4 sm:$0xff]  }
  0xac   :  { %1781 = vmatpush1.bf16.msra.mxu0 %v3273_v2  ;;  %1868 = vmatprep.subr.bf16.mxu1 %v3284_v5  ;;  %v3357_v2 = vld [vmem:[#allocation10 + $0x740] ss:$16 sps:$4 sm:$0xff]   ;;  %v3368_v5 = vld [vmem:[#allocation10 + $0x36c] ss:$16 sps:$4 sm:$0xff]  }
  0xad   :  { %1782 = vmatprep.subr.bf16.mxu0 %v3281_v4  ;;  %v3365_v4 = vld [vmem:[#allocation10 + $0x764] ss:$16 sps:$4 sm:$0xff]  }
  0xaf   :  { %1869 = vmatpush1.bf16.msra.mxu1 %v3282_v7  ;;  %v3366_v7 = vld [vmem:[#allocation10 + $0x368] ss:$16 sps:$4 sm:$0xff]  }
  0xb0   :  { %1783 = vmatpush1.bf16.msra.mxu0 %v3279_v6  ;;  %1870 = vmatprep.subr.bf16.mxu1 %v3290_v9  ;;  %v3363_v6 = vld [vmem:[#allocation10 + $0x760] ss:$16 sps:$4 sm:$0xff]   ;;  %v3374_v9 = vld [vmem:[#allocation10 + $0x38c] ss:$16 sps:$4 sm:$0xff]  }
  0xb1   :  { %1784 = vmatprep.subr.bf16.mxu0 %v3287_v8  ;;  %v3371_v8 = vld [vmem:[#allocation10 + $0x784] ss:$16 sps:$4 sm:$0xff]  }
  0xb3   :  { %1871 = vmatpush1.bf16.msra.mxu1 %v3288_v11  ;;  %v3372_v11 = vld [vmem:[#allocation10 + $0x388] ss:$16 sps:$4 sm:$0xff]  }
  0xb4   :  { %1785 = vmatpush1.bf16.msra.mxu0 %v3285_v10  ;;  %1872 = vmatprep.subr.bf16.mxu1 %v3296_v14  ;;  %v3369_v10 = vld [vmem:[#allocation10 + $0x780] ss:$16 sps:$4 sm:$0xff]   ;;  %v3380_v14 = vld [vmem:[#allocation10 + $0x3ac] ss:$16 sps:$4 sm:$0xff]  }
  0xb5   :  { %1786 = vmatprep.subr.bf16.mxu0 %v3293_v13  ;;  %v3377_v13 = vld [vmem:[#allocation10 + $0x7a4] ss:$16 sps:$4 sm:$0xff]  }
  0xb7   :  { %1873 = vmatpush1.bf16.msra.mxu1 %v3294_v17  ;;  %v3378_v17 = vld [vmem:[#allocation10 + $0x3a8] ss:$16 sps:$4 sm:$0xff]  }
  0xb8   :  { %1787 = vmatpush1.bf16.msra.mxu0 %v3291_v16  ;;  %1885 = vmatprep.subr.bf16.mxu1 %v3302_v21  ;;  %v3375_v16 = vld [vmem:[#allocation10 + $0x7a0] ss:$16 sps:$4 sm:$0xff]   ;;  %v3384_v21 = vld [vmem:[#allocation10 + $0x3c8] ss:$16 sps:$4 sm:$0xff]  }
  0xb9   :  { %1799 = vmatprep.subr.bf16.mxu0 %v3299_v18  ;;  %v3383_v18 = vld [vmem:[#allocation10 + $0x7c4] ss:$16 sps:$4 sm:$0xff]  }
  0xba   :  { %1875 = vmatmul.mubr.bf16.vlgmr.msra.gmra.mrb[4].mxu1 %v3842_v12  ;;  %v3317_v12 = vld [vmem:[#allocation10 + $0x664] ss:$16 sps:$4 sm:$0xff]  }
  0xbb   :  { %1789 = vmatmul.mubr.bf16.vlgmr.msra.gmra.mrb[0].mxu0 %v3852_v24  ;;  %1886 = vmatpush1.bf16.msra.mxu1 %v3300_v23  ;;  %v3392_v23 = vld [vmem:[#allocation10 + $0x3ec] ss:$16 sps:$4 sm:$0xff]  }
  0xbc   :  { %1800 = vmatpush1.bf16.msra.mxu0 %v3297_v22  ;;  %1887 = vmatprep.subr.bf16.mxu1 %v3308_v26  ;;  %v3389_v22 = vld [vmem:[#allocation10 + $0x7e4] ss:$16 sps:$4 sm:$0xff]   ;;  %v3390_v26 = vld [vmem:[#allocation10 + $0x3e8] ss:$16 sps:$4 sm:$0xff]  }
  0xbd   :  { %1801 = vmatprep.subr.bf16.mxu0 %v3305_v25  ;;  %1917 = vmatprep.mubr.bf16.mxu1 %v3838_v55  ;;  %v3324_v55 = vld [vmem:[#allocation10 + $0x288] ss:$16 sps:$4 sm:$0xff]   ;;  %v3387_v25 = vld [vmem:[#allocation10 + $0x7e0] ss:$16 sps:$4 sm:$0xff]  }
  0xbe   :  { %1831 = vmatprep.mubr.bf16.mxu0 %v3856_v33 }
  0xbf   :  { %1888 = vmatpush1.bf16.msra.mxu1 %v3306_v28  ;;  %v102_v28 = vld [vmem:[#allocation7 + $0x70] sm:$0xff] }
  0xc0   :  { %1802 = vmatpush1.bf16.msra.mxu0 %v3303_v27  ;;  %1889 = vmatprep.subr.bf16.mxu1 %v3314_v32  ;;  %v94_v27 = vld [vmem:[#allocation7 + $0x30] sm:$0xff]  ;;  %v3398_v32 = vld [vmem:[#allocation10 + $0x42c] ss:$16 sps:$4 sm:$0xff]  }
  0xc1   :  { %1803 = vmatprep.subr.bf16.mxu0 %v3311_v29  ;;  %v3395_v29 = vld [vmem:[#allocation10 + $0x40c] ss:$16 sps:$4 sm:$0xff]   ;;  %v3860_v31 = vpack.c.bf16 %v102_v28, %v94_v27  ;;  %v3438_v27 = vld [vmem:[#allocation10 + $0x5e8] ss:$16 sps:$4 sm:$0xff]  }
  0xc2   :  { %v3443_v28 = vld [vmem:[#allocation10 + $0x60c] ss:$16 sps:$4 sm:$0xff]  }
  0xc3   :  { %1890 = vmatpush1.bf16.msra.mxu1 %v3312_v35  ;;  %v3491_v35 = vld [vmem:[#allocation12 + $0x4] ss:$8 sps:$4 sm:$0xff]  }
  0xc4   :  { %1804 = vmatpush1.bf16.msra.mxu0 %v3309_v34  ;;  %1891 = vmatprep.subr.bf16.mxu1 %v3320_v36  ;;  %v3489_v34 = vld [vmem:[#allocation12] ss:$8 sps:$4 sm:$0xff]   ;;  %v3494_v36 = vld [vmem:[#allocation12 + $0x14] ss:$8 sps:$4 sm:$0xff]  }
  0xc5   :  { %1805 = vmatprep.subr.bf16.mxu0 %v3317_v12  ;;  %v3396_v12 = vld [vmem:[#allocation10 + $0x428] ss:$16 sps:$4 sm:$0xff]  }
  0xc7   :  { %1892 = vmatpush1.bf16.msra.mxu1 %v3318_v38  ;;  %v3492_v38 = vld [vmem:[#allocation12 + $0x10] ss:$8 sps:$4 sm:$0xff]  }
  0xc8   :  { %1806 = vmatpush1.bf16.msra.mxu0 %v3315_v37  ;;  %1893 = vmatprep.subr.bf16.mxu1 %v3326_v40  ;;  %v3401_v37 = vld [vmem:[#allocation10 + $0x44c] ss:$16 sps:$4 sm:$0xff]   ;;  %v3399_v40 = vld [vmem:[#allocation10 + $0x448] ss:$16 sps:$4 sm:$0xff]  }
  0xc9   :  { %1807 = vmatprep.subr.bf16.mxu0 %v3323_v39  ;;  %v3497_v39 = vld [vmem:[#allocation12 + $0x24] ss:$8 sps:$4 sm:$0xff]  }
  0xcb   :  { %1894 = vmatpush1.bf16.msra.mxu1 %v3324_v55  ;;  %v3402_v55 = vld [vmem:[#allocation10 + $0x468] ss:$16 sps:$4 sm:$0xff]  }
  0xcc   :  { %1808 = vmatpush1.bf16.msra.mxu0 %v3321_v41  ;;  %1895 = vmatprep.subr.bf16.mxu1 %v3332_v43  ;;  %v3404_v41 = vld [vmem:[#allocation10 + $0x46c] ss:$16 sps:$4 sm:$0xff]  }
  0xcd   :  { %1809 = vmatprep.subr.bf16.mxu0 %v3329_v42  ;;  %v3407_v42 = vld [vmem:[#allocation10 + $0x48c] ss:$16 sps:$4 sm:$0xff]  }
  0xce   :  { %v3500_v43 = vld [vmem:[#allocation12 + $0x34] ss:$8 sps:$4 sm:$0xff]  }
  0xcf   :  { %1896 = vmatpush1.bf16.msra.mxu1 %v3330_v46  ;;  %v3405_v46 = vld [vmem:[#allocation10 + $0x488] ss:$16 sps:$4 sm:$0xff]  }
  0xd0   :  { %1810 = vmatpush1.bf16.msra.mxu0 %v3327_v45  ;;  %1897 = vmatprep.subr.bf16.mxu1 %v3338_v48  ;;  %v3503_v45 = vld [vmem:[#allocation12 + $0x44] ss:$8 sps:$4 sm:$0xff]   ;;  %v3501_v48 = vld [vmem:[#allocation12 + $0x40] ss:$8 sps:$4 sm:$0xff]  }
  0xd1   :  { %1811 = vmatprep.subr.bf16.mxu0 %v3335_v47  ;;  %v3410_v47 = vld [vmem:[#allocation10 + $0x4ac] ss:$16 sps:$4 sm:$0xff]  }
  0xd3   :  { %1898 = vmatpush1.bf16.msra.mxu1 %v3336_v50  ;;  %v3408_v50 = vld [vmem:[#allocation10 + $0x4a8] ss:$16 sps:$4 sm:$0xff]  }
  0xd4   :  { %1812 = vmatpush1.bf16.msra.mxu0 %v3333_v49  ;;  %1899 = vmatprep.subr.bf16.mxu1 %v3344_v52  ;;  %v3506_v49 = vld [vmem:[#allocation12 + $0x54] ss:$8 sps:$4 sm:$0xff]   ;;  %v3504_v52 = vld [vmem:[#allocation12 + $0x50] ss:$8 sps:$4 sm:$0xff]  }
  0xd5   :  { %1813 = vmatprep.subr.bf16.mxu0 %v3341_v51  ;;  %v3413_v51 = vld [vmem:[#allocation10 + $0x4cc] ss:$16 sps:$4 sm:$0xff]  }
  0xd7   :  { %1900 = vmatpush1.bf16.msra.mxu1 %v3342_v54  ;;  %v3411_v54 = vld [vmem:[#allocation10 + $0x4c8] ss:$16 sps:$4 sm:$0xff]  }
  0xd8   :  { %1814 = vmatpush1.bf16.msra.mxu0 %v3339_v53  ;;  %1901 = vmatprep.subr.bf16.mxu1 %v3350_v57  ;;  %v3509_v53 = vld [vmem:[#allocation12 + $0x64] ss:$8 sps:$4 sm:$0xff]   ;;  %v3507_v57 = vld [vmem:[#allocation12 + $0x60] ss:$8 sps:$4 sm:$0xff]  }
  0xd9   :  { %1815 = vmatprep.subr.bf16.mxu0 %v3347_v56  ;;  %v3416_v56 = vld [vmem:[#allocation10 + $0x4ec] ss:$16 sps:$4 sm:$0xff]  }
  0xdb   :  { %1902 = vmatpush1.bf16.msra.mxu1 %v3348_v59  ;;  %v3414_v59 = vld [vmem:[#allocation10 + $0x4e8] ss:$16 sps:$4 sm:$0xff]  }
  0xdc   :  { %1816 = vmatpush1.bf16.msra.mxu0 %v3345_v58  ;;  %1903 = vmatprep.subr.bf16.mxu1 %v3356_v61  ;;  %v3512_v58 = vld [vmem:[#allocation12 + $0x74] ss:$8 sps:$4 sm:$0xff]   ;;  %v3510_v61 = vld [vmem:[#allocation12 + $0x70] ss:$8 sps:$4 sm:$0xff]  }
  0xdd   :  { %1817 = vmatprep.subr.bf16.mxu0 %v3353_v60  ;;  %v3419_v60 = vld [vmem:[#allocation10 + $0x50c] ss:$16 sps:$4 sm:$0xff]  }
  0xdf   :  { %1904 = vmatpush1.bf16.msra.mxu1 %v3354_v63  ;;  %v3417_v63 = vld [vmem:[#allocation10 + $0x508] ss:$16 sps:$4 sm:$0xff]  }
  0xe0   :  { %1818 = vmatpush1.bf16.msra.mxu0 %v3351_v62  ;;  %1905 = vmatprep.subr.bf16.mxu1 %v3362_v1  ;;  %v3515_v62 = vld [vmem:[#allocation12 + $0x84] ss:$8 sps:$4 sm:$0xff]   ;;  %v3513_v1 = vld [vmem:[#allocation12 + $0x80] ss:$8 sps:$4 sm:$0xff]  }
  0xe1   :  { %1819 = vmatprep.subr.bf16.mxu0 %v3359_v0  ;;  %v3422_v0 = vld [vmem:[#allocation10 + $0x52c] ss:$16 sps:$4 sm:$0xff]  }
  0xe3   :  { %1906 = vmatpush1.bf16.msra.mxu1 %v3360_v3  ;;  %v3420_v3 = vld [vmem:[#allocation10 + $0x528] ss:$16 sps:$4 sm:$0xff]  }
  0xe4   :  { %1820 = vmatpush1.bf16.msra.mxu0 %v3357_v2  ;;  %1907 = vmatprep.subr.bf16.mxu1 %v3368_v5  ;;  %v3518_v2 = vld [vmem:[#allocation12 + $0x94] ss:$8 sps:$4 sm:$0xff]   ;;  %v3516_v5 = vld [vmem:[#allocation12 + $0x90] ss:$8 sps:$4 sm:$0xff]  }
  0xe5   :  { %1821 = vmatprep.subr.bf16.mxu0 %v3365_v4  ;;  %v3425_v4 = vld [vmem:[#allocation10 + $0x54c] ss:$16 sps:$4 sm:$0xff]  }
  0xe7   :  { %1908 = vmatpush1.bf16.msra.mxu1 %v3366_v7  ;;  %v3423_v7 = vld [vmem:[#allocation10 + $0x548] ss:$16 sps:$4 sm:$0xff]  }
  0xe8   :  { %1822 = vmatpush1.bf16.msra.mxu0 %v3363_v6  ;;  %1909 = vmatprep.subr.bf16.mxu1 %v3374_v9  ;;  %v3521_v6 = vld [vmem:[#allocation12 + $0xa4] ss:$8 sps:$4 sm:$0xff]   ;;  %v3519_v9 = vld [vmem:[#allocation12 + $0xa0] ss:$8 sps:$4 sm:$0xff]  }
  0xe9   :  { %1823 = vmatprep.subr.bf16.mxu0 %v3371_v8  ;;  %v3428_v8 = vld [vmem:[#allocation10 + $0x56c] ss:$16 sps:$4 sm:$0xff]  }
  0xeb   :  { %1910 = vmatpush1.bf16.msra.mxu1 %v3372_v11  ;;  %v3426_v11 = vld [vmem:[#allocation10 + $0x568] ss:$16 sps:$4 sm:$0xff]  }
  0xec   :  { %1824 = vmatpush1.bf16.msra.mxu0 %v3369_v10  ;;  %1911 = vmatprep.subr.bf16.mxu1 %v3380_v14  ;;  %v3524_v10 = vld [vmem:[#allocation12 + $0xb4] ss:$8 sps:$4 sm:$0xff]   ;;  %v3522_v14 = vld [vmem:[#allocation12 + $0xb0] ss:$8 sps:$4 sm:$0xff]  }
  0xed   :  { %1825 = vmatprep.subr.bf16.mxu0 %v3377_v13  ;;  %v3431_v13 = vld [vmem:[#allocation10 + $0x58c] ss:$16 sps:$4 sm:$0xff]  }
  0xef   :  { %1912 = vmatpush1.bf16.msra.mxu1 %v3378_v17  ;;  %v3429_v17 = vld [vmem:[#allocation10 + $0x588] ss:$16 sps:$4 sm:$0xff]  }
  0xf0   :  { %1826 = vmatpush1.bf16.msra.mxu0 %v3375_v16  ;;  %1913 = vmatprep.subr.bf16.mxu1 %v3386_v19  ;;  %v3527_v16 = vld [vmem:[#allocation12 + $0xc4] ss:$8 sps:$4 sm:$0xff]   ;;  %v3525_v19 = vld [vmem:[#allocation12 + $0xc0] ss:$8 sps:$4 sm:$0xff]  }
  0xf1   :  { %1827 = vmatprep.subr.bf16.mxu0 %v3383_v18  ;;  %v3434_v18 = vld [vmem:[#allocation10 + $0x5ac] ss:$16 sps:$4 sm:$0xff]  }
  0xf3   :  { %1914 = vmatpush1.bf16.msra.mxu1 %v3384_v21  ;;  %v3432_v21 = vld [vmem:[#allocation10 + $0x5a8] ss:$16 sps:$4 sm:$0xff]  }
  0xf4   :  { %1828 = vmatpush1.bf16.msra.mxu0 %v3381_v20  ;;  %1915 = vmatprep.subr.bf16.mxu1 %v3392_v23  ;;  %v3530_v20 = vld [vmem:[#allocation12 + $0xd4] ss:$8 sps:$4 sm:$0xff]   ;;  %v3528_v23 = vld [vmem:[#allocation12 + $0xd0] ss:$8 sps:$4 sm:$0xff]  }
  0xf5   :  { %1829 = vmatprep.subr.bf16.mxu0 %v3389_v22  ;;  %v3437_v22 = vld [vmem:[#allocation10 + $0x5cc] ss:$16 sps:$4 sm:$0xff]  }
  0xf7   :  { %1916 = vmatpush1.bf16.msra.mxu1 %v3390_v26  ;;  %v3440_v26 = vld [vmem:[#allocation10 + $0x5ec] ss:$16 sps:$4 sm:$0xff]  }
  0xf8   :  { %1830 = vmatpush1.bf16.msra.mxu0 %v3387_v25  ;;  %1928 = vmatprep.subr.bf16.mxu1 %v3395_v29  ;;  %v3435_v25 = vld [vmem:[#allocation10 + $0x5c8] ss:$16 sps:$4 sm:$0xff]  }
  0xf9   :  { %2410 = vmatprep.subr.bf16.mxu0 %v3491_v35  ;;  %v3441_v29 = vld [vmem:[#allocation10 + $0x608] ss:$16 sps:$4 sm:$0xff]  }
  0xfa   :  { %1918 = vmatmul.mubr.bf16.vlgmr.msra.gmra.mrb[4].mxu1 %v3844_v15  ;;  %v3495_v15 = vld [vmem:[#allocation12 + $0x20] ss:$8 sps:$4 sm:$0xff]  }
  0xfb   :  { %1832 = vmatmul.mubr.bf16.vlgmr.msra.gmra.mrb[0].mxu0 %v3860_v31  ;;  %1929 = vmatpush1.bf16.msra.mxu1 %v3393_v30  ;;  %v3446_v30 = vld [vmem:[#allocation10 + $0x62c] ss:$16 sps:$4 sm:$0xff]   ;;  %v3447_v35 = vld [vmem:[#allocation10 + $0x648] ss:$16 sps:$4 sm:$0xff]  }
  0xfc   :  { %1960 = vmatprep.mubr.bf16.mxu1 %v3849_v44  ;;  %1930 = vmatprep.subr.bf16.mxu1 %v3398_v32  ;;  %v3498_v44 = vld [vmem:[#allocation12 + $0x30] ss:$8 sps:$4 sm:$0xff]  }
  0xfd   :  { %2411 = vmatpush1.bf16.msra.mxu0 %v3489_v34  ;;  %v3444_v32 = vld [vmem:[#allocation10 + $0x628] ss:$16 sps:$4 sm:$0xff]   ;;  %v3449_v34 = vld [vmem:[#allocation10 + $0x64c] ss:$16 sps:$4 sm:$0xff]  }
  0xfe   :  { %2412 = vmatprep.subr.bf16.mxu0 %v3494_v36  ;;  %v3450_v36 = vld [vmem:[#allocation10 + $0x668] ss:$16 sps:$4 sm:$0xff]  }
  0xff   :  { %1931 = vmatpush1.bf16.msra.mxu1 %v3396_v12  ;;  %v3452_v12 = vld [vmem:[#allocation10 + $0x66c] ss:$16 sps:$4 sm:$0xff]  }
 0x100   :  { %1932 = vmatprep.subr.bf16.mxu1 %v3401_v37  ;;  %v3455_v37 = vld [vmem:[#allocation10 + $0x68c] ss:$16 sps:$4 sm:$0xff]  }
 0x101   :  { %2413 = vmatpush1.bf16.msra.mxu0 %v3492_v38  ;;  %v3453_v38 = vld [vmem:[#allocation10 + $0x688] ss:$16 sps:$4 sm:$0xff]  }
 0x102   :  { %2414 = vmatprep.subr.bf16.mxu0 %v3497_v39  ;;  %v3458_v39 = vld [vmem:[#allocation10 + $0x6ac] ss:$16 sps:$4 sm:$0xff]  }
 0x103   :  { %1933 = vmatpush1.bf16.msra.mxu1 %v3399_v40  ;;  %v3461_v40 = vld [vmem:[#allocation10 + $0x6cc] ss:$16 sps:$4 sm:$0xff]  }
 0x104   :  { %1934 = vmatprep.subr.bf16.mxu1 %v3404_v41 }
 0x105   :  { %2415 = vmatpush1.bf16.msra.mxu0 %v3495_v15  ;;  %v3533_v15 = vld [vmem:[#allocation12 + $0xe4] ss:$8 sps:$4 sm:$0xff]  }
 0x106   :  { %2416 = vmatprep.subr.bf16.mxu0 %v3500_v43  ;;  %v3531_v43 = vld [vmem:[#allocation12 + $0xe0] ss:$8 sps:$4 sm:$0xff]  }
 0x107   :  { %1935 = vmatpush1.bf16.msra.mxu1 %v3402_v55 }
 0x108   :  { %1936 = vmatprep.subr.bf16.mxu1 %v3407_v42  ;;  %v3459_v42 = vld [vmem:[#allocation10 + $0x6c8] ss:$16 sps:$4 sm:$0xff]  }
 0x109   :  { %2417 = vmatpush1.bf16.msra.mxu0 %v3498_v44 }
 0x10a   :  { %2418 = vmatprep.subr.bf16.mxu0 %v3503_v45  ;;  %v3464_v45 = vld [vmem:[#allocation10 + $0x6ec] ss:$16 sps:$4 sm:$0xff]  }
 0x10b   :  { %1937 = vmatpush1.bf16.msra.mxu1 %v3405_v46  ;;  %v3536_v46 = vld [vmem:[#allocation12 + $0xf4] ss:$8 sps:$4 sm:$0xff]  }
 0x10c   :  { %1938 = vmatprep.subr.bf16.mxu1 %v3410_v47  ;;  %v3462_v47 = vld [vmem:[#allocation10 + $0x6e8] ss:$16 sps:$4 sm:$0xff]  }
 0x10d   :  { %2419 = vmatpush1.bf16.msra.mxu0 %v3501_v48  ;;  %v3534_v48 = vld [vmem:[#allocation12 + $0xf0] ss:$8 sps:$4 sm:$0xff]  }
 0x10e   :  { %2420 = vmatprep.subr.bf16.mxu0 %v3506_v49  ;;  %v3467_v49 = vld [vmem:[#allocation10 + $0x70c] ss:$16 sps:$4 sm:$0xff]  }
 0x10f   :  { %1939 = vmatpush1.bf16.msra.mxu1 %v3408_v50  ;;  %v3465_v50 = vld [vmem:[#allocation10 + $0x708] ss:$16 sps:$4 sm:$0xff]  }
 0x110   :  { %1940 = vmatprep.subr.bf16.mxu1 %v3413_v51  ;;  %v3470_v51 = vld [vmem:[#allocation10 + $0x72c] ss:$16 sps:$4 sm:$0xff]  }
 0x111   :  { %2421 = vmatpush1.bf16.msra.mxu0 %v3504_v52  ;;  %v3539_v52 = vld [vmem:[#allocation12 + $0x104] ss:$8 sps:$4 sm:$0xff]  }
 0x112   :  { %2422 = vmatprep.subr.bf16.mxu0 %v3509_v53  ;;  %v3468_v53 = vld [vmem:[#allocation10 + $0x728] ss:$16 sps:$4 sm:$0xff]  }
 0x113   :  { %1941 = vmatpush1.bf16.msra.mxu1 %v3411_v54  ;;  %v3473_v54 = vld [vmem:[#allocation10 + $0x74c] ss:$16 sps:$4 sm:$0xff]  }
 0x114   :  { %1942 = vmatprep.subr.bf16.mxu1 %v3416_v56  ;;  %v3471_v56 = vld [vmem:[#allocation10 + $0x748] ss:$16 sps:$4 sm:$0xff]  }
 0x115   :  { %2423 = vmatpush1.bf16.msra.mxu0 %v3507_v57  ;;  %v3476_v57 = vld [vmem:[#allocation10 + $0x76c] ss:$16 sps:$4 sm:$0xff]  }
 0x116   :  { %2424 = vmatprep.subr.bf16.mxu0 %v3512_v58  ;;  %v3474_v58 = vld [vmem:[#allocation10 + $0x768] ss:$16 sps:$4 sm:$0xff]  }
 0x117   :  { %1943 = vmatpush1.bf16.msra.mxu1 %v3414_v59  ;;  %v3479_v59 = vld [vmem:[#allocation10 + $0x78c] ss:$16 sps:$4 sm:$0xff]  }
 0x118   :  { %1944 = vmatprep.subr.bf16.mxu1 %v3419_v60  ;;  %v3477_v60 = vld [vmem:[#allocation10 + $0x788] ss:$16 sps:$4 sm:$0xff]  }
 0x119   :  { %2425 = vmatpush1.bf16.msra.mxu0 %v3510_v61  ;;  %v3482_v61 = vld [vmem:[#allocation10 + $0x7ac] ss:$16 sps:$4 sm:$0xff]  }
 0x11a   :  { %2426 = vmatprep.subr.bf16.mxu0 %v3515_v62  ;;  %v3480_v62 = vld [vmem:[#allocation10 + $0x7a8] ss:$16 sps:$4 sm:$0xff]  }
 0x11b   :  { %1945 = vmatpush1.bf16.msra.mxu1 %v3417_v63  ;;  %v3485_v63 = vld [vmem:[#allocation10 + $0x7cc] ss:$16 sps:$4 sm:$0xff]  }
 0x11c   :  { %1946 = vmatprep.subr.bf16.mxu1 %v3422_v0  ;;  %v3483_v0 = vld [vmem:[#allocation10 + $0x7c8] ss:$16 sps:$4 sm:$0xff]  }
 0x11d   :  { %2427 = vmatpush1.bf16.msra.mxu0 %v3513_v1  ;;  %v3488_v1 = vld [vmem:[#allocation10 + $0x7ec] ss:$16 sps:$4 sm:$0xff]  }
 0x11e   :  { %2428 = vmatprep.subr.bf16.mxu0 %v3518_v2  ;;  %v3486_v2 = vld [vmem:[#allocation10 + $0x7e8] ss:$16 sps:$4 sm:$0xff]  }
 0x11f   :  { %1947 = vmatpush1.bf16.msra.mxu1 %v3420_v3  ;;  %v83_v3 = vlaneseq }
 0x120   :  { %1948 = vmatprep.subr.bf16.mxu1 %v3425_v4 }
 0x121   :  { %2429 = vmatpush1.bf16.msra.mxu0 %v3516_v5  ;;  %v3869_v4 = vshrl.u32 %v83_v3, 7  ;;  %vm3933_vm1 = vcmp.lt.s32.totalorder %v83_v3, 512 }
 0x122   :  { %2430 = vmatprep.subr.bf16.mxu0 %v3521_v6  ;;  %v3877_v6 = vld [vmem:[%s4010_s3] sm:$0xf] }
 0x123   :  { %1949 = vmatpush1.bf16.msra.mxu1 %v3423_v7  ;;  %v3872_v5 = vsub.s32 0, %v3869_v4  ;;  %v376_v7 = vsub.s32 1, %v3869_v4 }
 0x124   :  { %1950 = vmatprep.subr.bf16.mxu1 %v3428_v8 }
 0x125   :  { %2431 = vmatpush1.bf16.msra.mxu0 %v3519_v9  ;;  %v373_v8 = vrot.slane %v3877_v6, %v3872_v5  ;;  %v377_v9 = vrot.slane %v3877_v6, %v376_v7 }
 0x126   :  { %2432 = vmatprep.subr.bf16.mxu0 %v3524_v10 }
 0x127   :  { %1951 = vmatpush1.bf16.msra.mxu1 %v3426_v11 }
 0x128   :  { %1952 = vmatprep.subr.bf16.mxu1 %v3431_v13 }
 0x129   :  { %2433 = vmatpush1.bf16.msra.mxu0 %v3522_v14 }
 0x12a   :  { %2434 = vmatprep.subr.bf16.mxu0 %v3527_v16 }
 0x12b   :  { %1953 = vmatpush1.bf16.msra.mxu1 %v3429_v17 }
 0x12c   :  { %1954 = vmatprep.subr.bf16.mxu1 %v3434_v18 }
 0x12d   :  { %2435 = vmatpush1.bf16.msra.mxu0 %v3525_v19 }
 0x12e   :  { %2436 = vmatprep.subr.bf16.mxu0 %v3530_v20 }
 0x12f   :  { %1955 = vmatpush1.bf16.msra.mxu1 %v3432_v21 }
 0x130   :  { %1956 = vmatprep.subr.bf16.mxu1 %v3437_v22 }
 0x131   :  { %2437 = vmatpush1.bf16.msra.mxu0 %v3528_v23 }
 0x132   :  { %2438 = vmatprep.subr.bf16.mxu0 %v3533_v15  ;;  %v3560_v15 = vld [vmem:[#allocation12 + $0x174] ss:$8 sps:$4 sm:$0xff]  }
 0x133   :  { %1957 = vmatpush1.bf16.msra.mxu1 %v3435_v25 }
 0x134   :  { %1958 = vmatprep.subr.bf16.mxu1 %v3440_v26 }
 0x135   :  { %2439 = vmatpush1.bf16.msra.mxu0 %v3531_v43  ;;  %v3561_v43 = vld [vmem:[#allocation12 + $0x180] ss:$8 sps:$4 sm:$0xff]  }
 0x136   :  { %2440 = vmatprep.subr.bf16.mxu0 %v3536_v46  ;;  %v3569_v46 = vld [vmem:[#allocation12 + $0x1a4] ss:$8 sps:$4 sm:$0xff]  }
 0x137   :  { %1959 = vmatpush1.bf16.msra.mxu1 %v3438_v27 }
 0x138   :  { %1971 = vmatprep.subr.bf16.mxu1 %v3443_v28 }
 0x139   :  { %2441 = vmatpush1.bf16.msra.mxu0 %v3534_v48  ;;  %v3572_v48 = vld [vmem:[#allocation12 + $0x1b4] ss:$8 sps:$4 sm:$0xff]  }
 0x13a   :  { %1961 = vmatmul.mubr.bf16.vlgmr.msra.gmra.mrb[4].mxu1 %v3852_v24  ;;  %v3456_v24 = vld [vmem:[#allocation10 + $0x6a8] ss:$16 sps:$4 sm:$0xff]   ;;  %2453 = vmatprep.subr.bf16.mxu0 %v3539_v52  ;;  %v3578_v52 = vld [vmem:[#allocation12 + $0x1d4] ss:$8 sps:$4 sm:$0xff]  }
 0x13b   :  { %1972 = vmatpush1.bf16.msra.mxu1 %v3441_v29  ;;  %2003 = vmatprep.mubr.bf16.mxu1 %v3856_v33  ;;  %v3537_v29 = vld [vmem:[#allocation12 + $0x100] ss:$8 sps:$4 sm:$0xff]  }
 0x13c   :  { %1973 = vmatprep.subr.bf16.mxu1 %v3446_v30 }
 0x13f   :  { %1974 = vmatpush1.bf16.msra.mxu1 %v3444_v32  ;;  %v3542_v32 = vld [vmem:[#allocation12 + $0x114] ss:$8 sps:$4 sm:$0xff]  }
 0x140   :  { %1975 = vmatprep.subr.bf16.mxu1 %v3449_v34  ;;  %v3540_v34 = vld [vmem:[#allocation12 + $0x110] ss:$8 sps:$4 sm:$0xff]  }
 0x143   :  { %1976 = vmatpush1.bf16.msra.mxu1 %v3447_v35  ;;  %v3545_v35 = vld [vmem:[#allocation12 + $0x124] ss:$8 sps:$4 sm:$0xff]  }
 0x144   :  { %1977 = vmatprep.subr.bf16.mxu1 %v3452_v12  ;;  %v3543_v12 = vld [vmem:[#allocation12 + $0x120] ss:$8 sps:$4 sm:$0xff]  }
 0x147   :  { %1978 = vmatpush1.bf16.msra.mxu1 %v3450_v36  ;;  %v3548_v36 = vld [vmem:[#allocation12 + $0x134] ss:$8 sps:$4 sm:$0xff]  }
 0x148   :  { %1979 = vmatprep.subr.bf16.mxu1 %v3455_v37  ;;  %v3546_v37 = vld [vmem:[#allocation12 + $0x130] ss:$8 sps:$4 sm:$0xff]  }
 0x14b   :  { %1980 = vmatpush1.bf16.msra.mxu1 %v3453_v38  ;;  %v3551_v38 = vld [vmem:[#allocation12 + $0x144] ss:$8 sps:$4 sm:$0xff]  }
 0x14c   :  { %1981 = vmatprep.subr.bf16.mxu1 %v3458_v39  ;;  %v3549_v39 = vld [vmem:[#allocation12 + $0x140] ss:$8 sps:$4 sm:$0xff]  }
 0x14d   :  { %v1704_v41 = vpop.f32.mrb[0].mxu1 }
 0x14e   :  { %v1706_v33 = vpop.f32.mrb[1].mxu1 }
 0x14f   :  { %v1708_v55 = vpop.f32.mrb[2].mxu1  ;;  %1982 = vmatpush1.bf16.msra.mxu1 %v3456_v24  ;;  %v1707_v10 = vadd.f32 %v1706_v33, %v377_v9  ;;  %v3554_v24 = vld [vmem:[#allocation12 + $0x154] ss:$8 sps:$4 sm:$0xff]   ;;  %v3555_v33 = vld [vmem:[#allocation12 + $0x160] ss:$8 sps:$4 sm:$0xff]  }
 0x150   :  { %v1710_v44 = vpop.f32.mrb[3].mxu1  ;;  %1983 = vmatprep.subr.bf16.mxu1 %v3461_v40  ;;  %v1709_v13 = vadd.f32 %v1708_v55, %v373_v8  ;;  %v3552_v40 = vld [vmem:[#allocation12 + $0x150] ss:$8 sps:$4 sm:$0xff]  }
 0x151   :  { %v1711_v17 = vadd.f32 %v1710_v44, %v377_v9  ;;  %v3558_v55 = vld [vmem:[#allocation12 + $0x170] ss:$8 sps:$4 sm:$0xff]   ;;  %v3566_v44 = vld [vmem:[#allocation12 + $0x194] ss:$8 sps:$4 sm:$0xff]  }
 0x153   :  { %1984 = vmatpush1.bf16.msra.mxu1 %v3459_v42  ;;  %v3563_v42 = vld [vmem:[#allocation12 + $0x184] ss:$8 sps:$4 sm:$0xff]  }
 0x154   :  { %1985 = vmatprep.subr.bf16.mxu1 %v3464_v45  ;;  %v3564_v45 = vld [vmem:[#allocation12 + $0x190] ss:$8 sps:$4 sm:$0xff]  }
 0x157   :  { %1986 = vmatpush1.bf16.msra.mxu1 %v3462_v47  ;;  %v3567_v47 = vld [vmem:[#allocation12 + $0x1a0] ss:$8 sps:$4 sm:$0xff]  }
 0x158   :  { %1987 = vmatprep.subr.bf16.mxu1 %v3467_v49  ;;  %v3570_v49 = vld [vmem:[#allocation12 + $0x1b0] ss:$8 sps:$4 sm:$0xff]  }
 0x15b   :  { %1988 = vmatpush1.bf16.msra.mxu1 %v3465_v50  ;;  %v3575_v50 = vld [vmem:[#allocation12 + $0x1c4] ss:$8 sps:$4 sm:$0xff]  }
 0x15c   :  { %1989 = vmatprep.subr.bf16.mxu1 %v3470_v51  ;;  %v3573_v51 = vld [vmem:[#allocation12 + $0x1c0] ss:$8 sps:$4 sm:$0xff]  }
 0x15f   :  { %1990 = vmatpush1.bf16.msra.mxu1 %v3468_v53  ;;  %v3576_v53 = vld [vmem:[#allocation12 + $0x1d0] ss:$8 sps:$4 sm:$0xff]  }
 0x160   :  { %1991 = vmatprep.subr.bf16.mxu1 %v3473_v54  ;;  %v3581_v54 = vld [vmem:[#allocation12 + $0x1e4] ss:$8 sps:$4 sm:$0xff]  }
 0x163   :  { %1992 = vmatpush1.bf16.msra.mxu1 %v3471_v56  ;;  %v3579_v56 = vld [vmem:[#allocation12 + $0x1e0] ss:$8 sps:$4 sm:$0xff]  }
 0x164   :  { %1993 = vmatprep.subr.bf16.mxu1 %v3476_v57  ;;  %v3584_v57 = vld [vmem:[#allocation12 + $0x1f4] ss:$8 sps:$4 sm:$0xff]  }
 0x167   :  { %1994 = vmatpush1.bf16.msra.mxu1 %v3474_v58  ;;  %v3582_v58 = vld [vmem:[#allocation12 + $0x1f0] ss:$8 sps:$4 sm:$0xff]  }
 0x168   :  { %1995 = vmatprep.subr.bf16.mxu1 %v3479_v59  ;;  %v384_v59 = vsub.s32 3, %v3869_v4 }
 0x16b   :  { %1996 = vmatpush1.bf16.msra.mxu1 %v3477_v60  ;;  %v380_v60 = vsub.s32 2, %v3869_v4 }
 0x16c   :  { %1997 = vmatprep.subr.bf16.mxu1 %v3482_v61  ;;  %v385_v61 = vrot.slane %v3877_v6, %v384_v59 }
 0x16f   :  { %1998 = vmatpush1.bf16.msra.mxu1 %v3480_v62  ;;  %v381_v62 = vrot.slane %v3877_v6, %v380_v60 }
 0x170   :  { %1999 = vmatprep.subr.bf16.mxu1 %v3485_v63 }
 0x173   :  { %2000 = vmatpush1.bf16.msra.mxu1 %v3483_v0 }
 0x174   :  { %2001 = vmatprep.subr.bf16.mxu1 %v3488_v1 }
 0x177   :  { %2002 = vmatpush1.bf16.msra.mxu1 %v3486_v2 }
 0x17a   :  { %2004 = vmatmul.mubr.bf16.vlgmr.msra.gmra.mrb[4].mxu1 %v3860_v31  ;;  %v1705_v31 = vadd.f32 %v1704_v41, %v373_v8  ;;  %v3557_v41 = vld [vmem:[#allocation12 + $0x164] ss:$8 sps:$4 sm:$0xff]  }
 0x1ce   :  { %v1833_v11 = vpop.f32.mrb[0].mxu0 }
 0x1cf   :  { %v3883_v14 = vadd.f32 %v1833_v11, %v1705_v31  ;;  %v1835_v16 = vpop.f32.mrb[1].mxu0 }
 0x1d0   :  { %v3885_v18 = vadd.f32 %v1835_v16, %v1707_v10  ;;  %v1837_v19 = vpop.f32.mrb[2].mxu0 }
 0x1d1   :  { %v3887_v20 = vadd.f32 %v1837_v19, %v1709_v13  ;;  %v1839_v21 = vpop.f32.mrb[3].mxu0  ;;  %v2014_v27 = vmax.f32 %v3883_v14, 0.0 }
 0x1d2   :  { %v3889_v22 = vadd.f32 %v1839_v21, %v1711_v17  ;;  %v2015_v25 = vmax.f32 %v3885_v18, 0.0 }
 0x1d3   :  { %v2018_v23 = vmax.f32 %v3887_v20, 0.0 }
 0x1d4   :  { %v2019_v26 = vmax.f32 %v3889_v22, 0.0 }
 0x1d5   :  { %v2022_v30 = vpack.c.bf16 %v2018_v23, %v2014_v27 }
 0x1d6   :  { %v2023_v28 = vpack.c.bf16 %v2019_v26, %v2015_v25 }
 0x1d8   :  { %2442 = vmatprep.mubr.bf16.mxu0 %v2023_v28 }
 0x1d9   :  { %2443 = vmatmul.mubr.bf16.vlgmr.msra.gmra.mrb[4].mxu0 %v2022_v30 }
 0x1da   :  { %2454 = vmatpush1.bf16.msra.mxu0 %v3537_v29 }
 0x1db   :  { %2455 = vmatprep.subr.bf16.mxu0 %v3542_v32 }
 0x1de   :  { %2456 = vmatpush1.bf16.msra.mxu0 %v3540_v34 }
 0x1df   :  { %2457 = vmatprep.subr.bf16.mxu0 %v3545_v35 }
 0x1e2   :  { %2458 = vmatpush1.bf16.msra.mxu0 %v3543_v12 }
 0x1e3   :  { %2459 = vmatprep.subr.bf16.mxu0 %v3548_v36 }
 0x1e6   :  { %2460 = vmatpush1.bf16.msra.mxu0 %v3546_v37 }
 0x1e7   :  { %2461 = vmatprep.subr.bf16.mxu0 %v3551_v38 }
 0x1ea   :  { %2462 = vmatpush1.bf16.msra.mxu0 %v3549_v39  ;;  %v3050_v39 = vld [vmem:[%s4012_s5] ss:$0 sm:$0xff] }
 0x1eb   :  { %2463 = vmatprep.subr.bf16.mxu0 %v3554_v24 }
 0x1ee   :  { %2464 = vmatpush1.bf16.msra.mxu0 %v3552_v40 }
 0x1ef   :  { %2465 = vmatprep.subr.bf16.mxu0 %v3557_v41 }
 0x1f2   :  { %2466 = vmatpush1.bf16.msra.mxu0 %v3555_v33 }
 0x1f3   :  { %2467 = vmatprep.subr.bf16.mxu0 %v3560_v15 }
 0x1f6   :  { %2468 = vmatpush1.bf16.msra.mxu0 %v3558_v55 }
 0x1f7   :  { %2469 = vmatprep.subr.bf16.mxu0 %v3563_v42  ;;  %v3748_v42 = vmov -inf  }
 0x1f8   :  { %81 = vst.msk [vmem:[#allocation2] sm:$0x1] %vm80_vm0, %v3748_v42 }
 0x1fa   :  { %2470 = vmatpush1.bf16.msra.mxu0 %v3561_v43  ;;  %v3749_v43 = vmov 0  }
 0x1fb   :  { %2471 = vmatprep.subr.bf16.mxu0 %v3566_v44  ;;  %3104 = vset.pattern.permute.xlu0 %v3749_v43  ;;  %v3750_v44 = vmov 0.0  }
 0x1fc   :  { %82 = vst.msk [vmem:[#allocation3] sm:$0x1] %vm80_vm0, %v3750_v44  ;;  %3103 = vset.pattern.permute.xlu1 %v3749_v43 }
 0x1fd   :  { %87 = vst.msk [vmem:[#allocation4] sm:$0xf] %vm3933_vm1, %v3750_v44 }
 0x1fe   :  { %2472 = vmatpush1.bf16.msra.mxu0 %v3564_v45 }
 0x1ff   :  { %2473 = vmatprep.subr.bf16.mxu0 %v3569_v46  ;;  %v2529_v46 = vadd.s32 8, %v3869_v4 }
 0x202   :  { %2474 = vmatpush1.bf16.msra.mxu0 %v3567_v47  ;;  %v2533_v47 = vstv %s4007_s0  ;;  %s3751_s0 = smov [#allocation14]  }
 0x203   :  { %2475 = vmatprep.subr.bf16.mxu0 %v3572_v48  ;;  %vm2534_vm2 = vcmp.lt.s32.totalorder %v3869_v4, %v2533_v47  ;;  %vm2535_vm3 = vcmp.lt.s32.totalorder %v2529_v46, %v2533_v47  ;;  %s2701_s26 = sshll.u32 %s3751_s0, 4  ;;  %s2702_s26 = int_to_ptr.vmem [resolvable:$true] %s2701_s26 }
 0x204   :  { %s3665_s2 = scalar_lea.vmem %s2702_s26, 16  ;;  %s3669_s28 = scalar_lea.vmem %s2702_s26, 32 }
 0x205   :  { %p3666_p10 = scmp.ne.s32.totalorder %s2702_s26, %s3665_s2  ;;  %p3670_p11 = scmp.lt.s32.totalorder %s2702_s26, %s2702_s26 }
 0x206   :  { %2476 = vmatpush1.bf16.msra.mxu0 %v3570_v49  ;;  %p3671_p12 = scmp.lt.s32.totalorder %s3669_s28, %s3665_s2 }
 0x207   :  { %2477 = vmatprep.subr.bf16.mxu0 %v3575_v50 }
 0x208   :  { %p3672_p13 = por %p3671_p12, %p3670_p11 }
 0x20a   :  { %2478 = vmatpush1.bf16.msra.mxu0 %v3573_v51  ;;  %p3673_p0 = pnand %p3672_p13, %p3666_p10 }
 0x20b   :  { %2479 = vmatprep.subr.bf16.mxu0 %v3578_v52 }
 0x20e   :  { %2480 = vmatpush1.bf16.msra.mxu0 %v3576_v53 }
 0x20f   :  { %2481 = vmatprep.subr.bf16.mxu0 %v3581_v54 }
 0x212   :  { %2482 = vmatpush1.bf16.msra.mxu0 %v3579_v56 }
 0x213   :  { %2483 = vmatprep.subr.bf16.mxu0 %v3584_v57 }
 0x216   :  { %2484 = vmatpush1.bf16.msra.mxu0 %v3582_v58  ;;  %v2538_v58 = vld [vmem:[#allocation2] sm:$0x1] }
 0x24d   :  { %v2005_v63 = vpop.f32.mrb[4].mxu1 }
 0x24e   :  { %v2007_v0 = vpop.f32.mrb[5].mxu1  ;;  %v3909_v7 = vadd.f32 %v2005_v63, %v381_v62 }
 0x24f   :  { %v3907_v1 = vadd.f32 %v2007_v0, %v385_v61  ;;  %v2009_v2 = vpop.f32.mrb[6].mxu1 }
 0x250   :  { %v3911_v8 = vadd.f32 %v2009_v2, %v381_v62  ;;  %v2011_v9 = vpop.f32.mrb[7].mxu1  ;;  %v2016_v6 = vmax.f32 %v3909_v7, 0.0 }
 0x251   :  { %v3913_v31 = vadd.f32 %v2011_v9, %v385_v61  ;;  %v2017_v11 = vmax.f32 %v3907_v1, 0.0 }
 0x252   :  { %v2020_v10 = vmax.f32 %v3911_v8, 0.0 }
 0x253   :  { %v2021_v13 = vmax.f32 %v3913_v31, 0.0 }
 0x254   :  { %v2024_v17 = vpack.c.bf16 %v2020_v10, %v2016_v6 }
 0x255   :  { %v2025_v16 = vpack.c.bf16 %v2021_v13, %v2017_v11 }
 0x257   :  { %2485 = vmatprep.mubr.bf16.mxu0 %v2025_v16 }
 0x258   :  { %2486 = vmatmul.mubr.bf16.vlgmr.msra.gmra.mrb[4].mxu0 %v2024_v17 }
 0x32b   :  { %v2487_v19 = vpop.f32.mrb[4].mxu0 }
 0x32c   :  { %v2489_v21 = vpop.f32.mrb[5].mxu0  ;;  %v2496_v37 = vmax.f32 %v2487_v19, 0.0 }
 0x32d   :  { %v3048_v28 = vmul.f32 -1.442695, %v2489_v21  ;;  %v2491_v29 = vpop.f32.mrb[6].mxu0 }
 0x32e   :  { %v2493_v30 = vpop.f32.mrb[7].mxu0  ;;  %v2497_v24 = vmax.f32 %v2491_v29, 0.0 }
 0x32f   :  { %3585 = vpow2.f32 %v3048_v28  ;;  %v3049_v32 = vmul.f32 -1.442695, %v2493_v30 }
 0x331   :  { %3587 = vpow2.f32 %v3049_v32 }
 0x339   :  { %v3586_v34 = vpop.eup %3585 }
 0x33a   :  { %v2504_v35 = vadd.f32 1.0, %v3586_v34 }
 0x33b   :  { %v3588_v12 = vpop.eup %3587 }
 0x33c   :  { %3589 = vrcp.f32 %v2504_v35  ;;  %v2505_v36 = vadd.f32 1.0, %v3588_v12 }
 0x33e   :  { %3591 = vrcp.f32 %v2505_v36 }
 0x346   :  { %v3590_v38 = vpop.eup %3589 }
 0x347   :  { %v2510_v40 = vmul.f32 %v3590_v38, %v2496_v37 }
 0x348   :  { %v3592_v41 = vpop.eup %3591 }
 0x349   :  { %v2519_v33 = vmul.f32 %v3050_v39, %v2510_v40  ;;  %v2511_v15 = vmul.f32 %v3592_v41, %v2497_v24  ;;  %v2568_v24 = vld [vmem:[#allocation3] sm:$0x1] }
 0x34b   :  { %2521 = vadd.xlane.f32.xlu0 %v2519_v33  ;;  %v2520_v55 = vmul.f32 %v3050_v39, %v2511_v15 }
 0x34f   :  { %2523 = vadd.xlane.f32.xlu0 %v2520_v55 }
 0x3d8   :  { %v2522_v48 = vpop.xlane.xlu0 %2521 }
 0x3d9   :  { %v2536_v50 = vsel %vm2534_vm2, %v2522_v48, -inf }
 0x3da   :  { %vm2552_vm6 = vcmp.eq.f32.partialorder %v2536_v50, -inf }
 0x3dc   :  { %v2524_v49 = vpop.xlane.xlu0 %2523 }
 0x3dd   :  { %v2537_v51 = vsel %vm2535_vm3, %v2524_v49, -inf }
 0x3de   :  { %v2539_v3 = vmax.f32 %v2536_v50, %v2537_v51  ;;  %vm2553_vm7 = vcmp.eq.f32.partialorder %v2537_v51, -inf }
 0x3e0   :  { %v2540_v52 = vrot.slane %v2539_v3, 4 }
 0x3e2   :  { %v2541_v53 = vmax.f32 %v2539_v3, %v2540_v52 }
 0x3e4   :  { %v2542_v54 = vrot.slane %v2541_v53, 2 }
 0x3e6   :  { %v2543_v56 = vmax.f32 %v2541_v53, %v2542_v54 }
 0x3e8   :  { %v2544_v57 = vrot.slane %v2543_v56, 1 }
 0x3ea   :  { %v2545_v59 = vmax.f32 %v2543_v56, %v2544_v57 }
 0x3ec   :  { %v2546_v60 = vmax.f32 %v2538_v58, %v2545_v59 }
 0x3ee   :  { %v2558_v61 = vrot.slane %v2546_v60, %v3872_v5  ;;  %2675 = vst.msk [vmem:[#allocation2] sm:$0x1] %vm80_vm0, %v2546_v60  ;;  %v2548_v62 = vsub.f32 %v2538_v58, %v2546_v60  ;;  %vm2547_vm4 = vcmp.eq.f32.partialorder %v2546_v60, -inf }
 0x3f0   :  { %v2560_v63 = vsub.f32 %v2536_v50, %v2558_v61  ;;  %v2561_v0 = vsub.f32 %v2537_v51, %v2558_v61  ;;  %v2549_v2 = vmul.f32 1.442695, %v2548_v62 }
 0x3f2   :  { %v2562_v9 = vmul.f32 1.442695, %v2560_v63  ;;  %v2564_v16 = vmul.f32 1.442695, %v2561_v0  ;;  %3593 = vpow2.f32 %v2549_v2 }
 0x3f4   :  { %3595 = vpow2.f32 %v2562_v9 }
 0x3f5   :  { %3597 = vpow2.f32 %v2564_v16  ;;  %v2679_v17 = vld [vmem:[#allocation2] sm:$0x1] }
 0x3f6   :  { %2680 = vst.msk [vmem:[#allocation13] sm:$0x1] %vm80_vm0, %v2679_v17 }
 0x3fc   :  { %v3594_v19 = vpop.eup %3593 }
 0x3fd   :  { %v2551_v21 = vsel %vm2547_vm4, 0.0, %v3594_v19 }
 0x3fe   :  { %v3596_v28 = vpop.eup %3595  ;;  %2586 = vperm.xlu0 %3104, %v2551_v21   ;;  %v2569_v41 = vmul.f32 %v2568_v24, %v2551_v21 }
 0x3ff   :  { %v3598_v29 = vpop.eup %3597  ;;  %v2566_v30 = vsel %vm2552_vm6, 0.0, %v3596_v28 }
 0x400   :  { %2596 = vperm.xlu1 %3103, %v2566_v30   ;;  %v2571_v32 = vsel %vm2570_vm5, %v2566_v30, 0.0  ;;  %v2567_v34 = vsel %vm2553_vm7, 0.0, %v3598_v29 }
 0x401   :  { %v2572_v35 = vsel %vm2570_vm5, %v2567_v34, 0.0 }
 0x402   :  { %v2573_v12 = vadd.f32 %v2572_v35, %v2571_v32 }
 0x404   :  { %2601 = vperm.xlu1 %3103, %v2567_v34   ;;  %v2574_v36 = vrot.slane %v2573_v12, 4 }
 0x406   :  { %v2575_v37 = vadd.f32 %v2574_v36, %v2573_v12 }
 0x408   :  { %v2576_v38 = vrot.slane %v2575_v37, 2 }
 0x40a   :  { %v2577_v39 = vadd.f32 %v2576_v38, %v2575_v37 }
 0x40c   :  { %v2578_v40 = vrot.slane %v2577_v39, 1 }
 0x40e   :  { %v2579_v33 = vadd.f32 %v2578_v40, %v2577_v39 }
 0x410   :  { %v2580_v15 = vadd.f32 %v2579_v33, %v2569_v41 }
 0x412   :  { %2582 = vst.msk [vmem:[#allocation3] sm:$0x1] %vm80_vm0, %v2580_v15 }
 0x419   :  { %v2681_v55 = vld [vmem:[#allocation3] sm:$0x1] }
 0x41a   :  { %2682 = vst.msk [vmem:[#allocation14] sm:$0x1] %vm80_vm0, %v2681_v55 }
 0x41b   :  { %3676 = shalt.err (!%p3673_p0)
}
 0x41c   :  { %s3677_s10 = scalar_lea.hbm %s4014_s7, 16 }
 0x41d   :  { %p3678_p1 = scmp.ne.s32.totalorder %s4014_s7, %s3677_s10  ;;  %p3681_p2 = scmp.lt.u32.totalorder %s3677_s10, %s4014_s7 }
 0x41f   :  { %p3683_p3 = pnand %p3681_p2, %p3678_p1 }
 0x421   :  { %3686 = shalt.err (!%p3683_p3)
}
 0x422   :  { %2704 = dma.vmem_to_hbm [thread:$0]  %s2702_s26, 16, %s4014_s7, [#allocation15]  }
 0x423   :  { %s3687_s17 = scalar_lea.vmem %s2692_s29, 16  ;;  %s3691_s18 = scalar_lea.vmem %s2692_s29, 32 }
 0x424   :  { %p3688_p4 = scmp.ne.s32.totalorder %s2692_s29, %s3687_s17  ;;  %p3692_p5 = scmp.lt.s32.totalorder %s2692_s29, %s2692_s29 }
 0x425   :  { %p3693_p6 = scmp.lt.s32.totalorder %s3691_s18, %s3687_s17 }
 0x427   :  { %p3694_p7 = por %p3693_p6, %p3692_p5 }
 0x429   :  { %p3695_p8 = pnand %p3694_p7, %p3688_p4 }
 0x42b   :  { %3698 = shalt.err (!%p3695_p8)
}
 0x42c   :  { %s3699_s20 = scalar_lea.hbm %s4013_s6, 16 }
 0x42d   :  { %p3700_p9 = scmp.ne.s32.totalorder %s4013_s6, %s3699_s20  ;;  %p3703_p10 = scmp.lt.u32.totalorder %s3699_s20, %s4013_s6 }
 0x42f   :  { %p3705_p11 = pnand %p3703_p10, %p3700_p9 }
 0x431   :  { %3708 = shalt.err (!%p3705_p11)
}
 0x432   :  { %2694 = dma.vmem_to_hbm [thread:$0]  %s2692_s29, 16, %s4013_s6, [#allocation9]   ;;  %v3753_v52 = vmov 1966171168   ;;  %v2583_v34 = vld [vmem:[#allocation4] sm:$0xf] }
 0x433   :  { %v2647_v20 = vunpack.c.l.s4 %v3753_v52  ;;  %s3754_s6 = smov [#allocation16]  }
 0x434   :  { %s2711_s24 = sshll.u32 %s3754_s6, 4  ;;  %s2712_s24 = int_to_ptr.vmem [resolvable:$true] %s2711_s24 }
 0x435   :  { %v2648_v31 = vunpack.c.0.s8 %v2647_v20  ;;  %s3709_s5 = scalar_lea.vmem %s2712_s24, 64  ;;  %p3714_p13 = scmp.lt.s32.totalorder %s2712_s24, %s2712_s24 }
 0x436   :  { %p3710_p12 = scmp.ne.s32.totalorder %s2712_s24, %s3709_s5  ;;  %p3715_p0 = scmp.lt.s32.totalorder %s3709_s5, %s3709_s5 }
 0x437   :  { %v2651_v0 = vsub.s32 %v2648_v31, %v3869_v4 }
 0x438   :  { %p3716_p1 = por %p3715_p0, %p3714_p13 }
 0x43a   :  { %p3717_p2 = pnand %p3716_p1, %p3710_p12 }
 0x47d   :  { %v2587_v19 = vpop.permute.xlu0 %2586 }
 0x47e   :  { %v2592_v29 = vrot.slane %v2587_v19, %v3872_v5 }
 0x47f   :  { %v2597_v42 = vpop.permute.xlu1 %2596 }
 0x480   :  { %v2604_v43 = vmul.f32 %v2597_v42, %v2014_v27  ;;  %v2605_v44 = vmul.f32 %v2597_v42, %v2015_v25  ;;  %v2606_v46 = vmul.f32 %v2597_v42, %v2016_v6  ;;  %v2607_v47 = vmul.f32 %v2597_v42, %v2017_v11 }
 0x481   :  { %v2593_v12 = vmul.f32 %v2592_v29, %v2583_v34 }
 0x483   :  { %v2602_v48 = vpop.permute.xlu1 %2601 }
 0x484   :  { %v2608_v49 = vmul.f32 %v2602_v48, %v2018_v23  ;;  %v2609_v50 = vmul.f32 %v2602_v48, %v2019_v26  ;;  %v2610_v14 = vmul.f32 %v2602_v48, %v2020_v10  ;;  %v2611_v18 = vmul.f32 %v2602_v48, %v2021_v13 }
 0x486   :  { %v2612_v25 = vadd.f32 %v2608_v49, %v2604_v43  ;;  %v2619_v27 = vadd.f32 %v2609_v50, %v2605_v44  ;;  %v2626_v7 = vadd.f32 %v2610_v14, %v2606_v46  ;;  %v2633_v6 = vadd.f32 %v2611_v18, %v2607_v47 }
 0x488   :  { %v2613_v51 = vrot.slane %v2612_v25, 4  ;;  %v2620_v1 = vrot.slane %v2619_v27, 4  ;;  %v2627_v11 = vrot.slane %v2626_v7, 4  ;;  %v2634_v3 = vrot.slane %v2633_v6, 4 }
 0x48a   :  { %v2614_v23 = vadd.f32 %v2613_v51, %v2612_v25  ;;  %v2621_v53 = vadd.f32 %v2620_v1, %v2619_v27  ;;  %v2628_v22 = vadd.f32 %v2627_v11, %v2626_v7  ;;  %v2635_v26 = vadd.f32 %v2634_v3, %v2633_v6 }
 0x48c   :  { %v2615_v54 = vrot.slane %v2614_v23, 2  ;;  %v2622_v8 = vrot.slane %v2621_v53, 2  ;;  %v2629_v10 = vrot.slane %v2628_v22, 2  ;;  %v2636_v56 = vrot.slane %v2635_v26, 2 }
 0x48e   :  { %v2616_v13 = vadd.f32 %v2615_v54, %v2614_v23  ;;  %v2623_v57 = vadd.f32 %v2622_v8, %v2621_v53  ;;  %v2630_v58 = vadd.f32 %v2629_v10, %v2628_v22  ;;  %v2637_v59 = vadd.f32 %v2636_v56, %v2635_v26 }
 0x490   :  { %v2617_v60 = vrot.slane %v2616_v13, 1  ;;  %v2624_v61 = vrot.slane %v2623_v57, 1  ;;  %v2631_v62 = vrot.slane %v2630_v58, 1  ;;  %v2638_v63 = vrot.slane %v2637_v59, 1 }
 0x492   :  { %v2618_v2 = vadd.f32 %v2617_v60, %v2616_v13  ;;  %v2625_v9 = vadd.f32 %v2624_v61, %v2623_v57  ;;  %v2632_v16 = vadd.f32 %v2631_v62, %v2630_v58  ;;  %v2639_v17 = vadd.f32 %v2638_v63, %v2637_v59 }
 0x494   :  { %v2644_v21 = vcombine.low %v2618_v2, %v2625_v9  ;;  %v2645_v28 = vcombine.low %v2632_v16, %v2639_v17 }
 0x496   :  { %v2652_v30 = vrot.slane %v2644_v21, %v2651_v0  ;;  %v2659_v32 = vrot.slane %v2645_v28, %v2651_v0 }
 0x498   :  { %v2660_v35 = vcombine.low %v2652_v30, %v2659_v32 }
 0x49a   :  { %v2667_v36 = vrot.slane %v2660_v35, %v2651_v0 }
 0x49c   :  { %v2669_v37 = vadd.f32 %v2667_v36, %v2593_v12 }
 0x49e   :  { %2674 = vst.msk [vmem:[#allocation4] sm:$0xf] %vm3933_vm1, %v2669_v37 }
 0x4a5   :  { %v2683_v4 = vld [vmem:[#allocation4] sm:$0xf] }
 0x4a6   :  { %2684 = vst.msk [vmem:[#allocation16] sm:$0xf] %vm3933_vm1, %v2683_v4 }
 0x4a7   :  { %3720 = shalt.err (!%p3717_p2)
}
 0x4a8   :  { %s3721_s26 = scalar_lea.hbm %s4015_s8, 64 }
 0x4a9   :  { %p3722_p3 = scmp.ne.s32.totalorder %s4015_s8, %s3721_s26  ;;  %p3725_p4 = scmp.lt.u32.totalorder %s3721_s26, %s4015_s8 }
 0x4ab   :  { %p3727_p5 = pnand %p3725_p4, %p3722_p3 }
 0x4ad   :  { %3730 = shalt.err (!%p3727_p5)
}
 0x4ae   :  { %2714 = dma.vmem_to_hbm [thread:$0]  %s2712_s24, 64, %s4015_s8, [#allocation15]  }
 0x4af   :  { %3735 = dma.done.wait [#allocation9], 16  }
 0x4b0   :  { %3736 = vsyncadd [#allocation9], 4294967280 }
 0x4b1   :  { %3737 = dma.done.wait [#allocation15], 80  }
 0x4b2   :  { %3738 = vsyncadd [#allocation15], 4294967216 }
 0x4b3   :  { %2724 = vsyncpa [#allocation8], 1 }
 0x4b4   :  { %2725 = vsyncpa [#allocation11], 1 }
 0x4b5   :  { %2726 = vsyncpa [#allocation9], 1 }
 0x4b6   :  { %2727 = vsyncpa [#allocation15], 1 }

</bundles_post_ra>
